<compile_context>
chip_gen: v5e
topology: v5e:2x2
jax: 0.10.0
libtpu: 0.0.40
codegen_flags: <defaults>
</compile_context>

<pallas_src>
import jax
import jax.numpy as jnp
from jax.experimental import pallas as pl
from jax.experimental.pallas import tpu as pltpu

_MXU_DTYPE = jnp.bfloat16   # MXU-input dtype (f32 accumulate in-kernel)
_ACT_DTYPE = jnp.bfloat16   # stored conv-stage activation dtype
_LANE = 128


def _rup(v, m):
    return ((v + m - 1) // m) * m


def _row_tile(m, cap=512):
    """Return (tile, padded_rows): rows padded to a multiple of 8 and a
    multiple-of-8 tile that divides them exactly (no out[:M] copy needed for
    the padded part beyond the 8-row remainder)."""
    mp = _rup(m, 8)
    if mp <= cap:
        # Split into two equal tiles when cheap so dual-TC (v7x) chips get two
        # "parallel" grid steps; otherwise a single step.
        if mp >= 256 and mp % 16 == 0:
            return mp // 2, mp
        return mp, mp
    for tm in range(cap, 7, -8):
        if mp % tm == 0:
            return tm, mp
    return cap, _rup(mp, cap)   # unreachable: 8 always divides mp


# ----------------------------- Pallas kernels ------------------------------ #

def _conv_relu_pool_kernel(p00_ref, p01_ref, p10_ref, p11_ref, w_ref, b_ref, o_ref):
    """Fused im2col-conv + bias + ReLU + 2x2/2 max-pool.

    p??: (TM, Kp) bf16 patch matrices, one per pool-window offset (dy, dx).
    w:   (Kp, Np) bf16 weight, b: (1, Np) f32 bias.
    o:   (TM, Np) bf16 pooled activations (rows ordered (b, pooled_y, pooled_x)).
    """
    w = w_ref[...]
    b = b_ref[...]

    def branch(p_ref):
        acc = jnp.dot(p_ref[...], w, preferred_element_type=jnp.float32)
        return jnp.maximum(acc + b, 0.0)          # f32 epilogue (v5e-safe)

    pooled = jnp.maximum(jnp.maximum(branch(p00_ref), branch(p01_ref)),
                         jnp.maximum(branch(p10_ref), branch(p11_ref)))
    o_ref[...] = pooled.astype(o_ref.dtype)


def _fc_fused_kernel(x_ref, w1_ref, b1_ref, w2_ref, b2_ref, w3_ref, b3_ref, o_ref):
    """Chained fc1 -> ReLU -> fc2 -> ReLU -> fc3, all weights VMEM-resident."""
    h = jnp.dot(x_ref[...], w1_ref[...], preferred_element_type=jnp.float32)
    h = jnp.maximum(h + b1_ref[...], 0.0)
    h = jnp.dot(h.astype(_MXU_DTYPE), w2_ref[...], preferred_element_type=jnp.float32)
    h = jnp.maximum(h + b2_ref[...], 0.0)
    h = jnp.dot(h.astype(_MXU_DTYPE), w3_ref[...], preferred_element_type=jnp.float32)
    o_ref[...] = (h + b3_ref[...]).astype(o_ref.dtype)


# ------------------------------ Pallas wrappers ----------------------------- #

def pallas_conv_relu_pool(patches, w_p, b_p):
    """Fused conv + ReLU + 2x2 pool.

    patches: list of 4 (M, K) bf16 patch matrices (pool-window offsets).
    w_p: (Kp, Np) bf16 pre-padded weight, b_p: (1, Np) f32 pre-padded bias.
    Returns (M, Np) bf16 pooled activations (lane-dense channel axis).
    """
    M, K = patches[0].shape
    Kp, Np = w_p.shape
    tm, mp = _row_tile(M, cap=1024)
    pp = [jnp.pad(p, ((0, mp - M), (0, Kp - K))) for p in patches]
    out = pl.pallas_call(
        _conv_relu_pool_kernel,
        out_shape=jax.ShapeDtypeStruct((mp, Np), _ACT_DTYPE),
        grid=(mp // tm,),
        in_specs=[pl.BlockSpec((tm, Kp), lambda i: (i, 0)) for _ in range(4)]
        + [pl.BlockSpec((Kp, Np), lambda i: (0, 0)),
           pl.BlockSpec((1, Np), lambda i: (0, 0))],
        out_specs=pl.BlockSpec((tm, Np), lambda i: (i, 0)),
        compiler_params=pltpu.CompilerParams(dimension_semantics=("parallel",)),
    )(*pp, w_p, b_p)
    return out[:M] if mp != M else out


def pallas_fc_fused(x, w1, b1, w2, b2, w3, b3):
    """Fused fc1(relu) -> fc2(relu) -> fc3 in a single pallas_call.

    x: (M, K) bf16/f32 features; weights pre-padded bf16, biases (1, Np) f32.
    Returns (Mp, N3p) f32 logits (rows/cols still lane-padded; slice outside).
    """
    M, K = x.shape
    K1p, N1p = w1.shape
    N2p = w2.shape[1]
    N3p = w3.shape[1]
    tm, mp = _row_tile(M)
    xp = jnp.pad(x.astype(_MXU_DTYPE), ((0, mp - M), (0, K1p - K)))
    out = pl.pallas_call(
        _fc_fused_kernel,
        out_shape=jax.ShapeDtypeStruct((mp, N3p), jnp.float32),
        grid=(mp // tm,),
        in_specs=[
            pl.BlockSpec((tm, K1p), lambda i: (i, 0)),
            pl.BlockSpec((K1p, N1p), lambda i: (0, 0)),
            pl.BlockSpec((1, N1p), lambda i: (0, 0)),
            pl.BlockSpec((N1p, N2p), lambda i: (0, 0)),
            pl.BlockSpec((1, N2p), lambda i: (0, 0)),
            pl.BlockSpec((N2p, N3p), lambda i: (0, 0)),
            pl.BlockSpec((1, N3p), lambda i: (0, 0)),
        ],
        out_specs=pl.BlockSpec((tm, N3p), lambda i: (i, 0)),
        compiler_params=pltpu.CompilerParams(dimension_semantics=("parallel",)),
    )(xp, w1, b1, w2, b2, w3, b3)
    return out


# ------------------------------ LeNet forward ------------------------------- #

def _im2col_pool_split(x, k, pad):
    """x: (B, H, W, C) (bf16).  Returns ([P00, P01, P10, P11], HoP, WoP) where
    P_{dy,dx} is the (B*HoP*WoP, k*k*C) im2col patch matrix for the conv-output
    positions (2*py+dy, 2*px+dx) — i.e. one matrix per 2x2 pool-window member.
    Patch columns ordered (ky, kx, c) to match prepare_params' conv weights."""
    B, H, W, C = x.shape
    if pad:
        x = jnp.pad(x, ((0, 0), (pad, pad), (pad, pad), (0, 0)))
    Ho = H + 2 * pad - k + 1
    Wo = W + 2 * pad - k + 1
    HoP, WoP = Ho // 2, Wo // 2
    pieces = []
    for dy in range(2):
        for dx in range(2):
            cols = [x[:, dy + ky: dy + ky + 2 * HoP: 2,
                       dx + kx: dx + kx + 2 * WoP: 2, :]
                    for ky in range(k) for kx in range(k)]
            p = jnp.concatenate(cols, axis=-1)          # (B, HoP, WoP, k*k*C)
            pieces.append(p.reshape(B * HoP * WoP, k * k * C))
    return pieces, HoP, WoP


def lenet_forward(x, p):
    """x: (B, 1, 28, 28) f32 NCHW, p: prepared (padded / bf16) parameters."""
    B = x.shape[0]
    # NCHW -> NHWC (singleton channel: free reshape) and cast ONCE to bf16 so
    # all downstream im2col / pad glue moves half the bytes.
    h = x.transpose(0, 2, 3, 1).astype(_ACT_DTYPE)                     # (B,28,28,1)

    # conv1 (5x5, pad 2) + ReLU + 2x2 pool, fused; channels lane-padded to 128.
    pieces, HoP, WoP = _im2col_pool_split(h, k=5, pad=2)               # 4x (B*196, 25)
    h = pallas_conv_relu_pool(pieces, p["w_conv1"], p["b_conv1"])      # (B*196, 128)
    h = h.reshape(B, HoP, WoP, _LANE)[..., :6]                         # (B,14,14,6)

    # conv2 (5x5, valid) + ReLU + 2x2 pool, fused.
    pieces, HoP, WoP = _im2col_pool_split(h, k=5, pad=0)               # 4x (B*25, 150)
    h = pallas_conv_relu_pool(pieces, p["w_conv2"], p["b_conv2"])      # (B*25, 128)
    feat = h.reshape(B, HoP, WoP, _LANE)[..., :16].reshape(B, 16 * 5 * 5)

    # Fused fc1(relu) -> fc2(relu) -> fc3.  fc1 rows were pre-permuted to the
    # NHWC flatten order in prepare_params, so this matches torch's view(B,-1).
    logits = pallas_fc_fused(feat, p["w_fc1"], p["b_fc1"], p["w_fc2"], p["b_fc2"],
                             p["w_fc3"], p["b_fc3"])
    return logits[:B, :10]                                             # (B, 10) f32


# --------------------------- parameter preparation --------------------------- #

def prepare_params(params):
    """One-time (outside jit) layout prep: pad K/N to 128-multiples, cast to
    bf16, and adapt PyTorch conventions to the kernels' channels-last layout."""

    def pad2(a, rows, cols):
        return jnp.pad(a, ((0, rows - a.shape[0]), (0, cols - a.shape[1])))

    def conv_w(w):  # (Co, Ci, kh, kw) -> (Kp, Np), rows ordered (ky, kx, ci)
        co, ci, k, _ = w.shape
        w2 = w.transpose(2, 3, 1, 0).reshape(k * k * ci, co)
        return pad2(w2, _rup(w2.shape[0], _LANE), _rup(co, _LANE)).astype(_MXU_DTYPE)

    def fc_w(w):    # (in, out) -> padded bf16
        return pad2(w, _rup(w.shape[0], _LANE), _rup(w.shape[1], _LANE)).astype(_MXU_DTYPE)

    def bias(b):
        n = _rup(b.shape[0], _LANE)
        return jnp.pad(b, (0, n - b.shape[0])).reshape(1, n).astype(jnp.float32)

    # fc1 weight rows are in torch's (c, h, w) flatten order; permute them to
    # (h, w, c) so the NHWC-flattened feature can be used without transposing
    # the activations (numerically identical to the PyTorch forward).
    w_fc1 = params["w_fc1"].reshape(16, 5, 5, 100).transpose(1, 2, 0, 3).reshape(400, 100)

    return {
        "w_conv1": conv_w(params["w_conv1"]), "b_conv1": bias(params["b_conv1"]),
        "w_conv2": conv_w(params["w_conv2"]), "b_conv2": bias(params["b_conv2"]),
        "w_fc1": fc_w(w_fc1),                 "b_fc1": bias(params["b_fc1"]),
        "w_fc2": fc_w(params["w_fc2"]),       "b_fc2": bias(params["b_fc2"]),
        "w_fc3": fc_w(params["w_fc3"]),       "b_fc3": bias(params["b_fc3"]),
    }


def init_params(key):
    ks = jax.random.split(key, 10)
    f32 = jnp.float32

    def rnd(k, shape, scale):
        return (jax.random.normal(k, shape, f32) * scale).astype(f32)

    # PyTorch-convention conv shapes; fc weights stored (in, out) = Linear.weight.T.
    return {
        "w_conv1": rnd(ks[0], (6, 1, 5, 5), 0.1),
        "b_conv1": rnd(ks[1], (6,), 0.1),
        "w_conv2": rnd(ks[2], (16, 6, 5, 5), 0.1),
        "b_conv2": rnd(ks[3], (16,), 0.1),
        "w_fc1": rnd(ks[4], (16 * 5 * 5, 100), 0.05),
        "b_fc1": rnd(ks[5], (100,), 0.05),
        "w_fc2": rnd(ks[6], (100, 70), 0.05),
        "b_fc2": rnd(ks[7], (70,), 0.05),
        "w_fc3": rnd(ks[8], (70, 10), 0.05),
        "b_fc3": rnd(ks[9], (10,), 0.05),
    }


if __name__ == "__main__":
    key = jax.random.PRNGKey(0)
    k_params, k_input = jax.random.split(key)
    params = init_params(k_params)
    prepared = prepare_params(params)     # one-time padding / cast, outside jit
    # LeNet's FC stage requires 28x28 spatial input (16*5*5 = 400 features).
    x = jax.random.normal(k_input, (2, 1, 28, 28), jnp.float32)

    out = jax.jit(lenet_forward)(x, prepared)
    out = jax.block_until_ready(out)
    assert out.shape == (2, 10) and out.dtype == jnp.float32
    print("KERNEL_OK")
</pallas_src>

<mosaic_0001>
module attributes {stable_mosaic.version = 11 : i64} {
  func.func @_conv_relu_pool_kernel(%arg0: i32, %arg1: memref<392x128xbf16, #tpu.memory_space<vmem>>, %arg2: memref<392x128xbf16, #tpu.memory_space<vmem>>, %arg3: memref<392x128xbf16, #tpu.memory_space<vmem>>, %arg4: memref<392x128xbf16, #tpu.memory_space<vmem>>, %arg5: memref<128x128xbf16, #tpu.memory_space<vmem>>, %arg6: memref<1x128xf32, #tpu.memory_space<vmem>>, %arg7: memref<392x128xbf16, #tpu.memory_space<vmem>>) attributes {dimension_semantics = [#tpu.dimension_semantics<parallel>], iteration_bounds = array<i64: 1>, scalar_prefetch = 0 : i64, scratch_operands = 0 : i64, tpu.core_type = #tpu.core_type<tc>, window_params = [{transform_indices = @transform_0, window_bounds = array<i64: 392, 128>}, {transform_indices = @transform_1, window_bounds = array<i64: 392, 128>}, {transform_indices = @transform_2, window_bounds = array<i64: 392, 128>}, {transform_indices = @transform_3, window_bounds = array<i64: 392, 128>}, {pipeline_mode = #tpu.pipeline_mode<synchronous>, transform_indices = @transform_4, window_bounds = array<i64: 128, 128>}, {pipeline_mode = #tpu.pipeline_mode<synchronous>, transform_indices = @transform_5, window_bounds = array<i64: 1, 128>}, {transform_indices = @transform_6, window_bounds = array<i64: 392, 128>}]} {
    %c0 = arith.constant 0 : index
    %c0_0 = arith.constant 0 : index
    %0 = vector.load %arg5[%c0, %c0_0] : memref<128x128xbf16, #tpu.memory_space<vmem>>, vector<128x128xbf16>
    %c0_1 = arith.constant 0 : index
    %c0_2 = arith.constant 0 : index
    %1 = vector.load %arg6[%c0_1, %c0_2] : memref<1x128xf32, #tpu.memory_space<vmem>>, vector<1x128xf32>
    %c0_3 = arith.constant 0 : index
    %c0_4 = arith.constant 0 : index
    %2 = vector.load %arg1[%c0_3, %c0_4] : memref<392x128xbf16, #tpu.memory_space<vmem>>, vector<392x128xbf16>
    %cst = arith.constant dense<0.000000e+00> : vector<392x128xf32>
    %3 = tpu.matmul %2, %0, %cst {dimension_numbers = #tpu.dot_dimension_numbers<[1], [0], [0], [1], [0, 0, 1, 1], [], []>} : vector<392x128xbf16>, vector<128x128xbf16>, vector<392x128xf32> -> vector<392x128xf32>
    %4 = vector.broadcast %1 : vector<1x128xf32> to vector<392x128xf32>
    %5 = arith.addf %3, %4 : vector<392x128xf32>
    %cst_5 = arith.constant 0.000000e+00 : f32
    %6 = vector.broadcast %cst_5 : f32 to vector<392x128xf32>
    %7 = arith.maximumf %5, %6 : vector<392x128xf32>
    %c0_6 = arith.constant 0 : index
    %c0_7 = arith.constant 0 : index
    %8 = vector.load %arg2[%c0_6, %c0_7] : memref<392x128xbf16, #tpu.memory_space<vmem>>, vector<392x128xbf16>
    %cst_8 = arith.constant dense<0.000000e+00> : vector<392x128xf32>
    %9 = tpu.matmul %8, %0, %cst_8 {dimension_numbers = #tpu.dot_dimension_numbers<[1], [0], [0], [1], [0, 0, 1, 1], [], []>} : vector<392x128xbf16>, vector<128x128xbf16>, vector<392x128xf32> -> vector<392x128xf32>
    %10 = vector.broadcast %1 : vector<1x128xf32> to vector<392x128xf32>
    %11 = arith.addf %9, %10 : vector<392x128xf32>
    %cst_9 = arith.constant 0.000000e+00 : f32
    %12 = vector.broadcast %cst_9 : f32 to vector<392x128xf32>
    %13 = arith.maximumf %11, %12 : vector<392x128xf32>
    %14 = arith.maximumf %7, %13 : vector<392x128xf32>
    %c0_10 = arith.constant 0 : index
    %c0_11 = arith.constant 0 : index
    %15 = vector.load %arg3[%c0_10, %c0_11] : memref<392x128xbf16, #tpu.memory_space<vmem>>, vector<392x128xbf16>
    %cst_12 = arith.constant dense<0.000000e+00> : vector<392x128xf32>
    %16 = tpu.matmul %15, %0, %cst_12 {dimension_numbers = #tpu.dot_dimension_numbers<[1], [0], [0], [1], [0, 0, 1, 1], [], []>} : vector<392x128xbf16>, vector<128x128xbf16>, vector<392x128xf32> -> vector<392x128xf32>
    %17 = vector.broadcast %1 : vector<1x128xf32> to vector<392x128xf32>
    %18 = arith.addf %16, %17 : vector<392x128xf32>
    %cst_13 = arith.constant 0.000000e+00 : f32
    %19 = vector.broadcast %cst_13 : f32 to vector<392x128xf32>
    %20 = arith.maximumf %18, %19 : vector<392x128xf32>
    %c0_14 = arith.constant 0 : index
    %c0_15 = arith.constant 0 : index
    %21 = vector.load %arg4[%c0_14, %c0_15] : memref<392x128xbf16, #tpu.memory_space<vmem>>, vector<392x128xbf16>
    %cst_16 = arith.constant dense<0.000000e+00> : vector<392x128xf32>
    %22 = tpu.matmul %21, %0, %cst_16 {dimension_numbers = #tpu.dot_dimension_numbers<[1], [0], [0], [1], [0, 0, 1, 1], [], []>} : vector<392x128xbf16>, vector<128x128xbf16>, vector<392x128xf32> -> vector<392x128xf32>
    %23 = vector.broadcast %1 : vector<1x128xf32> to vector<392x128xf32>
    %24 = arith.addf %22, %23 : vector<392x128xf32>
    %cst_17 = arith.constant 0.000000e+00 : f32
    %25 = vector.broadcast %cst_17 : f32 to vector<392x128xf32>
    %26 = arith.maximumf %24, %25 : vector<392x128xf32>
    %27 = arith.maximumf %20, %26 : vector<392x128xf32>
    %28 = arith.maximumf %14, %27 : vector<392x128xf32>
    %29 = arith.truncf %28 : vector<392x128xf32> to vector<392x128xbf16>
    %c0_18 = arith.constant 0 : index
    %c0_19 = arith.constant 0 : index
    %30 = vector.load %arg7[%c0_18, %c0_19] : memref<392x128xbf16, #tpu.memory_space<vmem>>, vector<392x128xbf16>
    tpu.vector_store %arg7[%c0_18, %c0_19], %29 {strides = array<i32>} : memref<392x128xbf16, #tpu.memory_space<vmem>>, vector<392x128xbf16>,
    return
  }
  func.func @transform_0(%arg0: i32) -> (i32, i32) {
    %c0_i32 = arith.constant 0 : i32
    %c0_i32_0 = arith.constant 0 : i32
    return %arg0, %c0_i32 : i32, i32
  }
  func.func @transform_1(%arg0: i32) -> (i32, i32) {
    %c0_i32 = arith.constant 0 : i32
    %c0_i32_0 = arith.constant 0 : i32
    return %arg0, %c0_i32 : i32, i32
  }
  func.func @transform_2(%arg0: i32) -> (i32, i32) {
    %c0_i32 = arith.constant 0 : i32
    %c0_i32_0 = arith.constant 0 : i32
    return %arg0, %c0_i32 : i32, i32
  }
  func.func @transform_3(%arg0: i32) -> (i32, i32) {
    %c0_i32 = arith.constant 0 : i32
    %c0_i32_0 = arith.constant 0 : i32
    return %arg0, %c0_i32 : i32, i32
  }
  func.func @transform_4(%arg0: i32) -> (i32, i32) {
    %c0_i32 = arith.constant 0 : i32
    %c0_i32_0 = arith.constant 0 : i32
    %c0_i32_1 = arith.constant 0 : i32
    return %c0_i32, %c0_i32_0 : i32, i32
  }
  func.func @transform_5(%arg0: i32) -> (i32, i32) {
    %c0_i32 = arith.constant 0 : i32
    %c0_i32_0 = arith.constant 0 : i32
    %c0_i32_1 = arith.constant 0 : i32
    return %c0_i32, %c0_i32_0 : i32, i32
  }
  func.func @transform_6(%arg0: i32) -> (i32, i32) {
    %c0_i32 = arith.constant 0 : i32
    %c0_i32_0 = arith.constant 0 : i32
    return %arg0, %c0_i32 : i32, i32
  }
}

module attributes {stable_mosaic.version = 11 : i64} {
  func.func @_conv_relu_pool_kernel(%arg0: i32, %arg1: memref<56x256xbf16, #tpu.memory_space<vmem>>, %arg2: memref<56x256xbf16, #tpu.memory_space<vmem>>, %arg3: memref<56x256xbf16, #tpu.memory_space<vmem>>, %arg4: memref<56x256xbf16, #tpu.memory_space<vmem>>, %arg5: memref<256x128xbf16, #tpu.memory_space<vmem>>, %arg6: memref<1x128xf32, #tpu.memory_space<vmem>>, %arg7: memref<56x128xbf16, #tpu.memory_space<vmem>>) attributes {dimension_semantics = [#tpu.dimension_semantics<parallel>], iteration_bounds = array<i64: 1>, scalar_prefetch = 0 : i64, scratch_operands = 0 : i64, tpu.core_type = #tpu.core_type<tc>, window_params = [{transform_indices = @transform_0, window_bounds = array<i64: 56, 256>}, {transform_indices = @transform_1, window_bounds = array<i64: 56, 256>}, {transform_indices = @transform_2, window_bounds = array<i64: 56, 256>}, {transform_indices = @transform_3, window_bounds = array<i64: 56, 256>}, {pipeline_mode = #tpu.pipeline_mode<synchronous>, transform_indices = @transform_4, window_bounds = array<i64: 256, 128>}, {pipeline_mode = #tpu.pipeline_mode<synchronous>, transform_indices = @transform_5, window_bounds = array<i64: 1, 128>}, {transform_indices = @transform_6, window_bounds = array<i64: 56, 128>}]} {
    %c0 = arith.constant 0 : index
    %c0_0 = arith.constant 0 : index
    %0 = vector.load %arg5[%c0, %c0_0] : memref<256x128xbf16, #tpu.memory_space<vmem>>, vector<256x128xbf16>
    %c0_1 = arith.constant 0 : index
    %c0_2 = arith.constant 0 : index
    %1 = vector.load %arg6[%c0_1, %c0_2] : memref<1x128xf32, #tpu.memory_space<vmem>>, vector<1x128xf32>
    %c0_3 = arith.constant 0 : index
    %c0_4 = arith.constant 0 : index
    %2 = vector.load %arg1[%c0_3, %c0_4] : memref<56x256xbf16, #tpu.memory_space<vmem>>, vector<56x256xbf16>
    %cst = arith.constant dense<0.000000e+00> : vector<56x128xf32>
    %3 = tpu.matmul %2, %0, %cst {dimension_numbers = #tpu.dot_dimension_numbers<[1], [0], [0], [1], [0, 0, 1, 1], [], []>} : vector<56x256xbf16>, vector<256x128xbf16>, vector<56x128xf32> -> vector<56x128xf32>
    %4 = vector.broadcast %1 : vector<1x128xf32> to vector<56x128xf32>
    %5 = arith.addf %3, %4 : vector<56x128xf32>
    %cst_5 = arith.constant 0.000000e+00 : f32
    %6 = vector.broadcast %cst_5 : f32 to vector<56x128xf32>
    %7 = arith.maximumf %5, %6 : vector<56x128xf32>
    %c0_6 = arith.constant 0 : index
    %c0_7 = arith.constant 0 : index
    %8 = vector.load %arg2[%c0_6, %c0_7] : memref<56x256xbf16, #tpu.memory_space<vmem>>, vector<56x256xbf16>
    %cst_8 = arith.constant dense<0.000000e+00> : vector<56x128xf32>
    %9 = tpu.matmul %8, %0, %cst_8 {dimension_numbers = #tpu.dot_dimension_numbers<[1], [0], [0], [1], [0, 0, 1, 1], [], []>} : vector<56x256xbf16>, vector<256x128xbf16>, vector<56x128xf32> -> vector<56x128xf32>
    %10 = vector.broadcast %1 : vector<1x128xf32> to vector<56x128xf32>
    %11 = arith.addf %9, %10 : vector<56x128xf32>
    %cst_9 = arith.constant 0.000000e+00 : f32
    %12 = vector.broadcast %cst_9 : f32 to vector<56x128xf32>
    %13 = arith.maximumf %11, %12 : vector<56x128xf32>
    %14 = arith.maximumf %7, %13 : vector<56x128xf32>
    %c0_10 = arith.constant 0 : index
    %c0_11 = arith.constant 0 : index
    %15 = vector.load %arg3[%c0_10, %c0_11] : memref<56x256xbf16, #tpu.memory_space<vmem>>, vector<56x256xbf16>
    %cst_12 = arith.constant dense<0.000000e+00> : vector<56x128xf32>
    %16 = tpu.matmul %15, %0, %cst_12 {dimension_numbers = #tpu.dot_dimension_numbers<[1], [0], [0], [1], [0, 0, 1, 1], [], []>} : vector<56x256xbf16>, vector<256x128xbf16>, vector<56x128xf32> -> vector<56x128xf32>
    %17 = vector.broadcast %1 : vector<1x128xf32> to vector<56x128xf32>
    %18 = arith.addf %16, %17 : vector<56x128xf32>
    %cst_13 = arith.constant 0.000000e+00 : f32
    %19 = vector.broadcast %cst_13 : f32 to vector<56x128xf32>
    %20 = arith.maximumf %18, %19 : vector<56x128xf32>
    %c0_14 = arith.constant 0 : index
    %c0_15 = arith.constant 0 : index
    %21 = vector.load %arg4[%c0_14, %c0_15] : memref<56x256xbf16, #tpu.memory_space<vmem>>, vector<56x256xbf16>
    %cst_16 = arith.constant dense<0.000000e+00> : vector<56x128xf32>
    %22 = tpu.matmul %21, %0, %cst_16 {dimension_numbers = #tpu.dot_dimension_numbers<[1], [0], [0], [1], [0, 0, 1, 1], [], []>} : vector<56x256xbf16>, vector<256x128xbf16>, vector<56x128xf32> -> vector<56x128xf32>
    %23 = vector.broadcast %1 : vector<1x128xf32> to vector<56x128xf32>
    %24 = arith.addf %22, %23 : vector<56x128xf32>
    %cst_17 = arith.constant 0.000000e+00 : f32
    %25 = vector.broadcast %cst_17 : f32 to vector<56x128xf32>
    %26 = arith.maximumf %24, %25 : vector<56x128xf32>
    %27 = arith.maximumf %20, %26 : vector<56x128xf32>
    %28 = arith.maximumf %14, %27 : vector<56x128xf32>
    %29 = arith.truncf %28 : vector<56x128xf32> to vector<56x128xbf16>
    %c0_18 = arith.constant 0 : index
    %c0_19 = arith.constant 0 : index
    %30 = vector.load %arg7[%c0_18, %c0_19] : memref<56x128xbf16, #tpu.memory_space<vmem>>, vector<56x128xbf16>
    tpu.vector_store %arg7[%c0_18, %c0_19], %29 {strides = array<i32>} : memref<56x128xbf16, #tpu.memory_space<vmem>>, vector<56x128xbf16>,
    return
  }
  func.func @transform_0(%arg0: i32) -> (i32, i32) {
    %c0_i32 = arith.constant 0 : i32
    %c0_i32_0 = arith.constant 0 : i32
    return %arg0, %c0_i32 : i32, i32
  }
  func.func @transform_1(%arg0: i32) -> (i32, i32) {
    %c0_i32 = arith.constant 0 : i32
    %c0_i32_0 = arith.constant 0 : i32
    return %arg0, %c0_i32 : i32, i32
  }
  func.func @transform_2(%arg0: i32) -> (i32, i32) {
    %c0_i32 = arith.constant 0 : i32
    %c0_i32_0 = arith.constant 0 : i32
    return %arg0, %c0_i32 : i32, i32
  }
  func.func @transform_3(%arg0: i32) -> (i32, i32) {
    %c0_i32 = arith.constant 0 : i32
    %c0_i32_0 = arith.constant 0 : i32
    return %arg0, %c0_i32 : i32, i32
  }
  func.func @transform_4(%arg0: i32) -> (i32, i32) {
    %c0_i32 = arith.constant 0 : i32
    %c0_i32_0 = arith.constant 0 : i32
    %c0_i32_1 = arith.constant 0 : i32
    return %c0_i32, %c0_i32_0 : i32, i32
  }
  func.func @transform_5(%arg0: i32) -> (i32, i32) {
    %c0_i32 = arith.constant 0 : i32
    %c0_i32_0 = arith.constant 0 : i32
    %c0_i32_1 = arith.constant 0 : i32
    return %c0_i32, %c0_i32_0 : i32, i32
  }
  func.func @transform_6(%arg0: i32) -> (i32, i32) {
    %c0_i32 = arith.constant 0 : i32
    %c0_i32_0 = arith.constant 0 : i32
    return %arg0, %c0_i32 : i32, i32
  }
}

module attributes {stable_mosaic.version = 11 : i64} {
  func.func @_fc_fused_kernel(%arg0: i32, %arg1: memref<8x512xbf16, #tpu.memory_space<vmem>>, %arg2: memref<512x128xbf16, #tpu.memory_space<vmem>>, %arg3: memref<1x128xf32, #tpu.memory_space<vmem>>, %arg4: memref<128x128xbf16, #tpu.memory_space<vmem>>, %arg5: memref<1x128xf32, #tpu.memory_space<vmem>>, %arg6: memref<128x128xbf16, #tpu.memory_space<vmem>>, %arg7: memref<1x128xf32, #tpu.memory_space<vmem>>, %arg8: memref<8x128xf32, #tpu.memory_space<vmem>>) attributes {dimension_semantics = [#tpu.dimension_semantics<parallel>], iteration_bounds = array<i64: 1>, scalar_prefetch = 0 : i64, scratch_operands = 0 : i64, tpu.core_type = #tpu.core_type<tc>, window_params = [{transform_indices = @transform_0, window_bounds = array<i64: 8, 512>}, {pipeline_mode = #tpu.pipeline_mode<synchronous>, transform_indices = @transform_1, window_bounds = array<i64: 512, 128>}, {pipeline_mode = #tpu.pipeline_mode<synchronous>, transform_indices = @transform_2, window_bounds = array<i64: 1, 128>}, {pipeline_mode = #tpu.pipeline_mode<synchronous>, transform_indices = @transform_3, window_bounds = array<i64: 128, 128>}, {pipeline_mode = #tpu.pipeline_mode<synchronous>, transform_indices = @transform_4, window_bounds = array<i64: 1, 128>}, {pipeline_mode = #tpu.pipeline_mode<synchronous>, transform_indices = @transform_5, window_bounds = array<i64: 128, 128>}, {pipeline_mode = #tpu.pipeline_mode<synchronous>, transform_indices = @transform_6, window_bounds = array<i64: 1, 128>}, {transform_indices = @transform_7, window_bounds = array<i64: 8, 128>}]} {
    %c0 = arith.constant 0 : index
    %c0_0 = arith.constant 0 : index
    %0 = vector.load %arg1[%c0, %c0_0] : memref<8x512xbf16, #tpu.memory_space<vmem>>, vector<8x512xbf16>
    %c0_1 = arith.constant 0 : index
    %c0_2 = arith.constant 0 : index
    %1 = vector.load %arg2[%c0_1, %c0_2] : memref<512x128xbf16, #tpu.memory_space<vmem>>, vector<512x128xbf16>
    %cst = arith.constant dense<0.000000e+00> : vector<8x128xf32>
    %2 = tpu.matmul %0, %1, %cst {dimension_numbers = #tpu.dot_dimension_numbers<[1], [0], [0], [1], [0, 0, 1, 1], [], []>} : vector<8x512xbf16>, vector<512x128xbf16>, vector<8x128xf32> -> vector<8x128xf32>
    %c0_3 = arith.constant 0 : index
    %c0_4 = arith.constant 0 : index
    %3 = vector.load %arg3[%c0_3, %c0_4] : memref<1x128xf32, #tpu.memory_space<vmem>>, vector<1x128xf32>
    %4 = vector.broadcast %3 : vector<1x128xf32> to vector<8x128xf32>
    %5 = arith.addf %2, %4 : vector<8x128xf32>
    %cst_5 = arith.constant 0.000000e+00 : f32
    %6 = vector.broadcast %cst_5 : f32 to vector<8x128xf32>
    %7 = arith.maximumf %5, %6 : vector<8x128xf32>
    %8 = arith.truncf %7 : vector<8x128xf32> to vector<8x128xbf16>
    %c0_6 = arith.constant 0 : index
    %c0_7 = arith.constant 0 : index
    %9 = vector.load %arg4[%c0_6, %c0_7] : memref<128x128xbf16, #tpu.memory_space<vmem>>, vector<128x128xbf16>
    %cst_8 = arith.constant dense<0.000000e+00> : vector<8x128xf32>
    %10 = tpu.matmul %8, %9, %cst_8 {dimension_numbers = #tpu.dot_dimension_numbers<[1], [0], [0], [1], [0, 0, 1, 1], [], []>} : vector<8x128xbf16>, vector<128x128xbf16>, vector<8x128xf32> -> vector<8x128xf32>
    %c0_9 = arith.constant 0 : index
    %c0_10 = arith.constant 0 : index
    %11 = vector.load %arg5[%c0_9, %c0_10] : memref<1x128xf32, #tpu.memory_space<vmem>>, vector<1x128xf32>
    %12 = vector.broadcast %11 : vector<1x128xf32> to vector<8x128xf32>
    %13 = arith.addf %10, %12 : vector<8x128xf32>
    %cst_11 = arith.constant 0.000000e+00 : f32
    %14 = vector.broadcast %cst_11 : f32 to vector<8x128xf32>
    %15 = arith.maximumf %13, %14 : vector<8x128xf32>
    %16 = arith.truncf %15 : vector<8x128xf32> to vector<8x128xbf16>
    %c0_12 = arith.constant 0 : index
    %c0_13 = arith.constant 0 : index
    %17 = vector.load %arg6[%c0_12, %c0_13] : memref<128x128xbf16, #tpu.memory_space<vmem>>, vector<128x128xbf16>
    %cst_14 = arith.constant dense<0.000000e+00> : vector<8x128xf32>
    %18 = tpu.matmul %16, %17, %cst_14 {dimension_numbers = #tpu.dot_dimension_numbers<[1], [0], [0], [1], [0, 0, 1, 1], [], []>} : vector<8x128xbf16>, vector<128x128xbf16>, vector<8x128xf32> -> vector<8x128xf32>
    %c0_15 = arith.constant 0 : index
    %c0_16 = arith.constant 0 : index
    %19 = vector.load %arg7[%c0_15, %c0_16] : memref<1x128xf32, #tpu.memory_space<vmem>>, vector<1x128xf32>
    %20 = vector.broadcast %19 : vector<1x128xf32> to vector<8x128xf32>
    %21 = arith.addf %18, %20 : vector<8x128xf32>
    %c0_17 = arith.constant 0 : index
    %c0_18 = arith.constant 0 : index
    %22 = vector.load %arg8[%c0_17, %c0_18] : memref<8x128xf32, #tpu.memory_space<vmem>>, vector<8x128xf32>
    tpu.vector_store %arg8[%c0_17, %c0_18], %21 {strides = array<i32>} : memref<8x128xf32, #tpu.memory_space<vmem>>, vector<8x128xf32>,
    return
  }
  func.func @transform_0(%arg0: i32) -> (i32, i32) {
    %c0_i32 = arith.constant 0 : i32
    %c0_i32_0 = arith.constant 0 : i32
    return %arg0, %c0_i32 : i32, i32
  }
  func.func @transform_1(%arg0: i32) -> (i32, i32) {
    %c0_i32 = arith.constant 0 : i32
    %c0_i32_0 = arith.constant 0 : i32
    %c0_i32_1 = arith.constant 0 : i32
    return %c0_i32, %c0_i32_0 : i32, i32
  }
  func.func @transform_2(%arg0: i32) -> (i32, i32) {
    %c0_i32 = arith.constant 0 : i32
    %c0_i32_0 = arith.constant 0 : i32
    %c0_i32_1 = arith.constant 0 : i32
    return %c0_i32, %c0_i32_0 : i32, i32
  }
  func.func @transform_3(%arg0: i32) -> (i32, i32) {
    %c0_i32 = arith.constant 0 : i32
    %c0_i32_0 = arith.constant 0 : i32
    %c0_i32_1 = arith.constant 0 : i32
    return %c0_i32, %c0_i32_0 : i32, i32
  }
  func.func @transform_4(%arg0: i32) -> (i32, i32) {
    %c0_i32 = arith.constant 0 : i32
    %c0_i32_0 = arith.constant 0 : i32
    %c0_i32_1 = arith.constant 0 : i32
    return %c0_i32, %c0_i32_0 : i32, i32
  }
  func.func @transform_5(%arg0: i32) -> (i32, i32) {
    %c0_i32 = arith.constant 0 : i32
    %c0_i32_0 = arith.constant 0 : i32
    %c0_i32_1 = arith.constant 0 : i32
    return %c0_i32, %c0_i32_0 : i32, i32
  }
  func.func @transform_6(%arg0: i32) -> (i32, i32) {
    %c0_i32 = arith.constant 0 : i32
    %c0_i32_0 = arith.constant 0 : i32
    %c0_i32_1 = arith.constant 0 : i32
    return %c0_i32, %c0_i32_0 : i32, i32
  }
  func.func @transform_7(%arg0: i32) -> (i32, i32) {
    %c0_i32 = arith.constant 0 : i32
    %c0_i32_0 = arith.constant 0 : i32
    return %arg0, %c0_i32 : i32, i32
  }
}

</mosaic_0001>

<bundles_post_ra>
// kernel: lenet_forward.3
= control target key start
LH: loop header
LB: loop body
LE: loop exit
PB: predicated region body
PF: predicated region fallthrough
CT: control target
= control target key end

     0   :  { %s3161_s4 = inlined_call_operand.vmem [shape: bf16[128,128], index: 4, kind: input, shape index: {}]   ;;  %s3162_s5 = inlined_call_operand.vmem [shape: f32[1,128], index: 5, kind: input, shape index: {}]   ;;  %s3163_s0 = inlined_call_operand.vmem [shape: bf16[392,128], index: 0, kind: input, shape index: {}]   ;;  %s3164_s1 = inlined_call_operand.vmem [shape: bf16[392,128], index: 1, kind: input, shape index: {}]   ;;  %s3165_s2 = inlined_call_operand.vmem [shape: bf16[392,128], index: 2, kind: input, shape index: {}]   ;;  %s3166_s3 = inlined_call_operand.vmem [shape: bf16[392,128], index: 3, kind: input, shape index: {}]   ;;  %s3167_s6 = inlined_call_operand.vmem [shape: bf16[392,128], index: 6, kind: output, shape index: {}]  }
   0x1   :  { %v2279_v0 = vld [vmem:[%s3161_s4 + $0x38] sm:$0xff]  ;;  %v2278_v1 = vld [vmem:[%s3161_s4 + $0x30] sm:$0xff]  ;;  %v2277_v2 = vld [vmem:[%s3161_s4 + $0x28] sm:$0xff] }
   0x2   :  { %288 = vmatpush.bf16.msra.mxu0 %v2279_v0  ;;  %667 = vmatpush.bf16.msra.mxu1 %v2279_v0  ;;  %v2276_v3 = vld [vmem:[%s3161_s4 + $0x20] sm:$0xff]  ;;  %v2275_v4 = vld [vmem:[%s3161_s4 + $0x18] sm:$0xff]  ;;  %v2274_v5 = vld [vmem:[%s3161_s4 + $0x10] sm:$0xff] }
   0x3   :  { %1095 = vmatpush.bf16.msra.mxu2 %v2279_v0  ;;  %1474 = vmatpush.bf16.msra.mxu3 %v2279_v0  ;;  %v2273_v6 = vld [vmem:[%s3161_s4 + $0x8] sm:$0xff]  ;;  %v2272_v7 = vld [vmem:[%s3161_s4] sm:$0xff]  ;;  %v2282_v16 = vld [vmem:[%s3163_s0 + $0x10] sm:$0xff] }
   0x4   :  { %v2280_v8 = vld [vmem:[%s3163_s0] sm:$0xff]  ;;  %v2281_v12 = vld [vmem:[%s3163_s0 + $0x8] sm:$0xff]  ;;  %v2306_v17 = vld [vmem:[%s3164_s1 + $0x10] sm:$0xff] }
   0x5   :  { %v2304_v9 = vld [vmem:[%s3164_s1] sm:$0xff]  ;;  %v2305_v13 = vld [vmem:[%s3164_s1 + $0x8] sm:$0xff]  ;;  %v2330_v18 = vld [vmem:[%s3165_s2 + $0x10] sm:$0xff] }
   0x6   :  { %289 = vmatpush.bf16.msra.mxu0 %v2278_v1  ;;  %668 = vmatpush.bf16.msra.mxu1 %v2278_v1  ;;  %v2328_v10 = vld [vmem:[%s3165_s2] sm:$0xff]  ;;  %v2329_v14 = vld [vmem:[%s3165_s2 + $0x8] sm:$0xff]  ;;  %v2354_v19 = vld [vmem:[%s3166_s3 + $0x10] sm:$0xff] }
   0x7   :  { %1096 = vmatpush.bf16.msra.mxu2 %v2278_v1  ;;  %1475 = vmatpush.bf16.msra.mxu3 %v2278_v1  ;;  %v2352_v11 = vld [vmem:[%s3166_s3] sm:$0xff]  ;;  %v2353_v15 = vld [vmem:[%s3166_s3 + $0x8] sm:$0xff]  ;;  %v2283_v20 = vld [vmem:[%s3163_s0 + $0x18] sm:$0xff] }
   0x8   :  { %v2307_v21 = vld [vmem:[%s3164_s1 + $0x18] sm:$0xff]  ;;  %v2284_v24 = vld [vmem:[%s3163_s0 + $0x20] sm:$0xff]  ;;  %v2285_v28 = vld [vmem:[%s3163_s0 + $0x28] sm:$0xff] }
   0x9   :  { %v2331_v22 = vld [vmem:[%s3165_s2 + $0x18] sm:$0xff]  ;;  %v2308_v25 = vld [vmem:[%s3164_s1 + $0x20] sm:$0xff]  ;;  %v2309_v29 = vld [vmem:[%s3164_s1 + $0x28] sm:$0xff] }
   0xa   :  { %290 = vmatpush.bf16.msra.mxu0 %v2277_v2  ;;  %669 = vmatpush.bf16.msra.mxu1 %v2277_v2  ;;  %v2355_v23 = vld [vmem:[%s3166_s3 + $0x18] sm:$0xff]  ;;  %v2332_v26 = vld [vmem:[%s3165_s2 + $0x20] sm:$0xff]  ;;  %v2333_v30 = vld [vmem:[%s3165_s2 + $0x28] sm:$0xff] }
   0xb   :  { %1097 = vmatpush.bf16.msra.mxu2 %v2277_v2  ;;  %1476 = vmatpush.bf16.msra.mxu3 %v2277_v2  ;;  %v2356_v27 = vld [vmem:[%s3166_s3 + $0x20] sm:$0xff]  ;;  %v2357_v31 = vld [vmem:[%s3166_s3 + $0x28] sm:$0xff]  ;;  %v2286_v32 = vld [vmem:[%s3163_s0 + $0x30] sm:$0xff] }
   0xc   :  { %v2310_v33 = vld [vmem:[%s3164_s1 + $0x30] sm:$0xff]  ;;  %v2287_v36 = vld [vmem:[%s3163_s0 + $0x38] sm:$0xff]  ;;  %v2288_v40 = vld [vmem:[%s3163_s0 + $0x40] sm:$0xff] }
   0xd   :  { %v2334_v34 = vld [vmem:[%s3165_s2 + $0x30] sm:$0xff]  ;;  %v2311_v37 = vld [vmem:[%s3164_s1 + $0x38] sm:$0xff]  ;;  %v2312_v41 = vld [vmem:[%s3164_s1 + $0x40] sm:$0xff] }
   0xe   :  { %291 = vmatpush.bf16.msra.mxu0 %v2276_v3  ;;  %670 = vmatpush.bf16.msra.mxu1 %v2276_v3  ;;  %v2358_v35 = vld [vmem:[%s3166_s3 + $0x30] sm:$0xff]  ;;  %v2335_v38 = vld [vmem:[%s3165_s2 + $0x38] sm:$0xff]  ;;  %v2336_v44 = vld [vmem:[%s3165_s2 + $0x40] sm:$0xff] }
   0xf   :  { %1098 = vmatpush.bf16.msra.mxu2 %v2276_v3  ;;  %1477 = vmatpush.bf16.msra.mxu3 %v2276_v3  ;;  %v2359_v39 = vld [vmem:[%s3166_s3 + $0x38] sm:$0xff]  ;;  %v2360_v45 = vld [vmem:[%s3166_s3 + $0x40] sm:$0xff]  ;;  %v2289_v63 = vld [vmem:[%s3163_s0 + $0x48] sm:$0xff] }
  0x10   :  { %v2691_v46 = vld [vmem:[%s3162_s5] ss:$0 sm:$0xff]  ;;  %v2313_v0 = vld [vmem:[%s3164_s1 + $0x48] sm:$0xff] }
  0x12   :  { %292 = vmatpush.bf16.msra.mxu0 %v2275_v4  ;;  %671 = vmatpush.bf16.msra.mxu1 %v2275_v4 }
  0x13   :  { %1099 = vmatpush.bf16.msra.mxu2 %v2275_v4  ;;  %1478 = vmatpush.bf16.msra.mxu3 %v2275_v4 }
  0x16   :  { %293 = vmatpush.bf16.msra.mxu0 %v2274_v5  ;;  %672 = vmatpush.bf16.msra.mxu1 %v2274_v5 }
  0x17   :  { %1100 = vmatpush.bf16.msra.mxu2 %v2274_v5  ;;  %1479 = vmatpush.bf16.msra.mxu3 %v2274_v5 }
  0x1a   :  { %294 = vmatpush.bf16.msra.mxu0 %v2273_v6  ;;  %673 = vmatpush.bf16.msra.mxu1 %v2273_v6 }
  0x1b   :  { %1101 = vmatpush.bf16.msra.mxu2 %v2273_v6  ;;  %1480 = vmatpush.bf16.msra.mxu3 %v2273_v6 }
  0x1e   :  { %295 = vmatpush.bf16.msra.mxu0 %v2272_v7  ;;  %674 = vmatpush.bf16.msra.mxu1 %v2272_v7 }
  0x1f   :  { %1102 = vmatpush.bf16.msra.mxu2 %v2272_v7  ;;  %1481 = vmatpush.bf16.msra.mxu3 %v2272_v7  ;;  %v2337_v7 = vld [vmem:[%s3165_s2 + $0x48] sm:$0xff] }
  0x21   :  { %296 = vmatmul.bf16.vlgmr.msra.gmra.mxu0 %v2280_v8  ;;  %675 = vmatmul.bf16.vlgmr.msra.gmra.mxu1 %v2304_v9  ;;  %v2361_v8 = vld [vmem:[%s3166_s3 + $0x48] sm:$0xff] }
  0x22   :  { %1103 = vmatmul.bf16.vlgmr.msra.gmra.mxu2 %v2328_v10  ;;  %1482 = vmatmul.bf16.vlgmr.msra.gmra.mxu3 %v2352_v11 }
  0x31   :  { %301 = vmatmul.bf16.gmra.mxu0 %v2281_v12  ;;  %680 = vmatmul.bf16.gmra.mxu1 %v2305_v13 }
  0x32   :  { %1108 = vmatmul.bf16.gmra.mxu2 %v2329_v14  ;;  %1487 = vmatmul.bf16.gmra.mxu3 %v2353_v15 }
  0x41   :  { %306 = vmatmul.bf16.gmra.mxu0 %v2282_v16  ;;  %685 = vmatmul.bf16.gmra.mxu1 %v2306_v17 }
  0x42   :  { %1113 = vmatmul.bf16.gmra.mxu2 %v2330_v18  ;;  %1492 = vmatmul.bf16.gmra.mxu3 %v2354_v19 }
  0x51   :  { %311 = vmatmul.bf16.gmra.mxu0 %v2283_v20  ;;  %690 = vmatmul.bf16.gmra.mxu1 %v2307_v21 }
  0x52   :  { %1118 = vmatmul.bf16.gmra.mxu2 %v2331_v22  ;;  %1497 = vmatmul.bf16.gmra.mxu3 %v2355_v23 }
  0x61   :  { %316 = vmatmul.bf16.gmra.mxu0 %v2284_v24  ;;  %695 = vmatmul.bf16.gmra.mxu1 %v2308_v25 }
  0x62   :  { %1123 = vmatmul.bf16.gmra.mxu2 %v2332_v26  ;;  %1502 = vmatmul.bf16.gmra.mxu3 %v2356_v27 }
  0x71   :  { %321 = vmatmul.bf16.gmra.mxu0 %v2285_v28  ;;  %700 = vmatmul.bf16.gmra.mxu1 %v2309_v29 }
  0x72   :  { %1128 = vmatmul.bf16.gmra.mxu2 %v2333_v30  ;;  %1507 = vmatmul.bf16.gmra.mxu3 %v2357_v31 }
  0x81   :  { %326 = vmatmul.bf16.gmra.mxu0 %v2286_v32  ;;  %705 = vmatmul.bf16.gmra.mxu1 %v2310_v33 }
  0x82   :  { %1133 = vmatmul.bf16.gmra.mxu2 %v2334_v34  ;;  %1512 = vmatmul.bf16.gmra.mxu3 %v2358_v35  ;;  %v2290_v34 = vld [vmem:[%s3163_s0 + $0x50] sm:$0xff] }
  0x83   :  { %v2314_v35 = vld [vmem:[%s3164_s1 + $0x50] sm:$0xff] }
  0x91   :  { %331 = vmatmul.bf16.gmra.mxu0 %v2287_v36  ;;  %710 = vmatmul.bf16.gmra.mxu1 %v2311_v37 }
  0x92   :  { %1138 = vmatmul.bf16.gmra.mxu2 %v2335_v38  ;;  %1517 = vmatmul.bf16.gmra.mxu3 %v2359_v39 }
  0x9e   :  { %v297_v42 = vpop.f32.mrf.mxu0  ;;  %v676_v43 = vpop.f32.mrf.mxu1 }
  0x9f   :  { %v298_v51 = vadd.f32 %v2691_v46, %v297_v42  ;;  %v677_v52 = vadd.f32 %v2691_v46, %v676_v43  ;;  %v2338_v42 = vld [vmem:[%s3165_s2 + $0x50] sm:$0xff] }
  0xa0   :  { %v2362_v43 = vld [vmem:[%s3166_s3 + $0x50] sm:$0xff] }
  0xa1   :  { %336 = vmatmul.bf16.gmra.mxu0 %v2288_v40  ;;  %715 = vmatmul.bf16.gmra.mxu1 %v2312_v41  ;;  %v421_v57 = vmax.f32 %v298_v51, 0.0  ;;  %v800_v58 = vmax.f32 %v677_v52, 0.0 }
  0xa2   :  { %1143 = vmatmul.bf16.gmra.mxu2 %v2336_v44  ;;  %1522 = vmatmul.bf16.gmra.mxu3 %v2360_v45 }
  0xa3   :  { %v849_v9 = vmax.f32 %v421_v57, %v800_v58 }
  0xa5   :  { %v1104_v47 = vpop.f32.mrf.mxu2  ;;  %v1483_v48 = vpop.f32.mrf.mxu3 }
  0xa6   :  { %v299_v49 = vpop.f32.mrf.mxu0  ;;  %v678_v50 = vpop.f32.mrf.mxu1  ;;  %v1105_v53 = vadd.f32 %v2691_v46, %v1104_v47  ;;  %v1484_v54 = vadd.f32 %v2691_v46, %v1483_v48 }
  0xa7   :  { %v300_v55 = vadd.f32 %v2691_v46, %v299_v49  ;;  %v679_v56 = vadd.f32 %v2691_v46, %v678_v50 }
  0xa8   :  { %v1228_v59 = vmax.f32 %v1105_v53, 0.0  ;;  %v1607_v60 = vmax.f32 %v1484_v54, 0.0 }
  0xa9   :  { %v422_v1 = vmax.f32 %v300_v55, 0.0  ;;  %v801_v2 = vmax.f32 %v679_v56, 0.0 }
  0xaa   :  { %v1656_v10 = vmax.f32 %v1228_v59, %v1607_v60 }
  0xab   :  { %v850_v13 = vmax.f32 %v422_v1, %v801_v2 }
  0xac   :  { %v1705_v15 = vmax.f32 %v849_v9, %v1656_v10 }
  0xad   :  { %v1106_v61 = vpop.f32.mrf.mxu2  ;;  %v1485_v62 = vpop.f32.mrf.mxu3 }
  0xae   :  { %v1107_v3 = vadd.f32 %v2691_v46, %v1106_v61  ;;  %v1486_v4 = vadd.f32 %v2691_v46, %v1485_v62  ;;  %v302_v5 = vpop.f32.mrf.mxu0  ;;  %v681_v6 = vpop.f32.mrf.mxu1 }
  0xaf   :  { %v303_v22 = vadd.f32 %v2691_v46, %v302_v5  ;;  %v682_v23 = vadd.f32 %v2691_v46, %v681_v6  ;;  %v2291_v6 = vld [vmem:[%s3163_s0 + $0x58] sm:$0xff] }
  0xb0   :  { %v1229_v11 = vmax.f32 %v1107_v3, 0.0  ;;  %v1608_v12 = vmax.f32 %v1486_v4, 0.0 }
  0xb1   :  { %341 = vmatmul.bf16.gmra.mxu0 %v2289_v63  ;;  %720 = vmatmul.bf16.gmra.mxu1 %v2313_v0  ;;  %v423_v28 = vmax.f32 %v303_v22, 0.0  ;;  %v802_v29 = vmax.f32 %v682_v23, 0.0 }
  0xb2   :  { %v1657_v14 = vmax.f32 %v1229_v11, %v1608_v12  ;;  %1148 = vmatmul.bf16.gmra.mxu2 %v2337_v7  ;;  %1527 = vmatmul.bf16.gmra.mxu3 %v2361_v8  ;;  %v2315_v7 = vld [vmem:[%s3164_s1 + $0x58] sm:$0xff] }
  0xb3   :  { %v851_v44 = vmax.f32 %v423_v28, %v802_v29 }
  0xb4   :  { %v1706_v16 = vmax.f32 %v850_v13, %v1657_v14  ;;  %v2339_v14 = vld [vmem:[%s3165_s2 + $0x58] sm:$0xff] }
  0xb5   :  { %v1109_v17 = vpop.f32.mrf.mxu2  ;;  %v1488_v18 = vpop.f32.mrf.mxu3 }
  0xb6   :  { %v2379_v19 = vpack.c.bf16 %v1706_v16, %v1705_v15  ;;  %v304_v20 = vpop.f32.mrf.mxu0  ;;  %v683_v21 = vpop.f32.mrf.mxu1  ;;  %v1110_v24 = vadd.f32 %v2691_v46, %v1109_v17  ;;  %v1489_v25 = vadd.f32 %v2691_v46, %v1488_v18  ;;  %v2363_v15 = vld [vmem:[%s3166_s3 + $0x58] sm:$0xff] }
  0xb7   :  { %v305_v26 = vadd.f32 %v2691_v46, %v304_v20  ;;  %v684_v27 = vadd.f32 %v2691_v46, %v683_v21 }
  0xb8   :  { %2380 = vst [vmem:[%s3167_s6] sm:$0xff] %v2379_v19   ;;  %v1230_v30 = vmax.f32 %v1110_v24, 0.0  ;;  %v1609_v31 = vmax.f32 %v1489_v25, 0.0 }
  0xb9   :  { %v424_v36 = vmax.f32 %v305_v26, 0.0  ;;  %v803_v37 = vmax.f32 %v684_v27, 0.0 }
  0xba   :  { %v1658_v45 = vmax.f32 %v1230_v30, %v1609_v31 }
  0xbb   :  { %v852_v49 = vmax.f32 %v424_v36, %v803_v37 }
  0xbc   :  { %v1707_v51 = vmax.f32 %v851_v44, %v1658_v45 }
  0xbd   :  { %v1111_v32 = vpop.f32.mrf.mxu2  ;;  %v1490_v33 = vpop.f32.mrf.mxu3 }
  0xbe   :  { %v1112_v38 = vadd.f32 %v2691_v46, %v1111_v32  ;;  %v1491_v39 = vadd.f32 %v2691_v46, %v1490_v33  ;;  %v307_v40 = vpop.f32.mrf.mxu0  ;;  %v686_v41 = vpop.f32.mrf.mxu1 }
  0xbf   :  { %v308_v58 = vadd.f32 %v2691_v46, %v307_v40  ;;  %v687_v59 = vadd.f32 %v2691_v46, %v686_v41  ;;  %v2292_v41 = vld [vmem:[%s3163_s0 + $0x60] sm:$0xff] }
  0xc0   :  { %v1231_v47 = vmax.f32 %v1112_v38, 0.0  ;;  %v1610_v48 = vmax.f32 %v1491_v39, 0.0 }
  0xc1   :  { %346 = vmatmul.bf16.gmra.mxu0 %v2290_v34  ;;  %725 = vmatmul.bf16.gmra.mxu1 %v2314_v35  ;;  %v425_v0 = vmax.f32 %v308_v58, 0.0  ;;  %v804_v1 = vmax.f32 %v687_v59, 0.0 }
  0xc2   :  { %v1659_v50 = vmax.f32 %v1231_v47, %v1610_v48  ;;  %1153 = vmatmul.bf16.gmra.mxu2 %v2338_v42  ;;  %1532 = vmatmul.bf16.gmra.mxu3 %v2362_v43  ;;  %v2316_v42 = vld [vmem:[%s3164_s1 + $0x60] sm:$0xff] }
  0xc3   :  { %v853_v16 = vmax.f32 %v425_v0, %v804_v1 }
  0xc4   :  { %v1708_v52 = vmax.f32 %v852_v49, %v1659_v50  ;;  %v2340_v50 = vld [vmem:[%s3165_s2 + $0x60] sm:$0xff] }
  0xc5   :  { %v1114_v53 = vpop.f32.mrf.mxu2  ;;  %v1493_v54 = vpop.f32.mrf.mxu3 }
  0xc6   :  { %v2384_v55 = vpack.c.bf16 %v1708_v52, %v1707_v51  ;;  %v309_v56 = vpop.f32.mrf.mxu0  ;;  %v688_v57 = vpop.f32.mrf.mxu1  ;;  %v1115_v60 = vadd.f32 %v2691_v46, %v1114_v53  ;;  %v1494_v61 = vadd.f32 %v2691_v46, %v1493_v54  ;;  %v2364_v51 = vld [vmem:[%s3166_s3 + $0x60] sm:$0xff] }
  0xc7   :  { %v310_v62 = vadd.f32 %v2691_v46, %v309_v56  ;;  %v689_v63 = vadd.f32 %v2691_v46, %v688_v57 }
  0xc8   :  { %2496 = vst [vmem:[%s3167_s6 + $0x8] sm:$0xff] %v2384_v55   ;;  %v1232_v2 = vmax.f32 %v1115_v60, 0.0  ;;  %v1611_v3 = vmax.f32 %v1494_v61, 0.0 }
  0xc9   :  { %v426_v8 = vmax.f32 %v310_v62, 0.0  ;;  %v805_v9 = vmax.f32 %v689_v63, 0.0 }
  0xca   :  { %v1660_v17 = vmax.f32 %v1232_v2, %v1611_v3 }
  0xcb   :  { %v854_v20 = vmax.f32 %v426_v8, %v805_v9 }
  0xcc   :  { %v1709_v22 = vmax.f32 %v853_v16, %v1660_v17 }
  0xcd   :  { %v1116_v4 = vpop.f32.mrf.mxu2  ;;  %v1495_v5 = vpop.f32.mrf.mxu3 }
  0xce   :  { %v1117_v10 = vadd.f32 %v2691_v46, %v1116_v4  ;;  %v1496_v11 = vadd.f32 %v2691_v46, %v1495_v5  ;;  %v312_v12 = vpop.f32.mrf.mxu0  ;;  %v691_v13 = vpop.f32.mrf.mxu1 }
  0xcf   :  { %v313_v29 = vadd.f32 %v2691_v46, %v312_v12  ;;  %v692_v30 = vadd.f32 %v2691_v46, %v691_v13  ;;  %v2293_v13 = vld [vmem:[%s3163_s0 + $0x68] sm:$0xff] }
  0xd0   :  { %v1233_v18 = vmax.f32 %v1117_v10, 0.0  ;;  %v1612_v19 = vmax.f32 %v1496_v11, 0.0 }
  0xd1   :  { %351 = vmatmul.bf16.gmra.mxu0 %v2291_v6  ;;  %730 = vmatmul.bf16.gmra.mxu1 %v2315_v7  ;;  %v427_v35 = vmax.f32 %v313_v29, 0.0  ;;  %v806_v36 = vmax.f32 %v692_v30, 0.0 }
  0xd2   :  { %v1661_v21 = vmax.f32 %v1233_v18, %v1612_v19  ;;  %1158 = vmatmul.bf16.gmra.mxu2 %v2339_v14  ;;  %1537 = vmatmul.bf16.gmra.mxu3 %v2363_v15  ;;  %v2317_v14 = vld [vmem:[%s3164_s1 + $0x68] sm:$0xff] }
  0xd3   :  { %v855_v52 = vmax.f32 %v427_v35, %v806_v36 }
  0xd4   :  { %v1710_v23 = vmax.f32 %v854_v20, %v1661_v21  ;;  %v2341_v21 = vld [vmem:[%s3165_s2 + $0x68] sm:$0xff] }
  0xd5   :  { %v1119_v24 = vpop.f32.mrf.mxu2  ;;  %v1498_v25 = vpop.f32.mrf.mxu3 }
  0xd6   :  { %v2389_v26 = vpack.c.bf16 %v1710_v23, %v1709_v22  ;;  %v314_v27 = vpop.f32.mrf.mxu0  ;;  %v693_v28 = vpop.f32.mrf.mxu1  ;;  %v1120_v31 = vadd.f32 %v2691_v46, %v1119_v24  ;;  %v1499_v32 = vadd.f32 %v2691_v46, %v1498_v25  ;;  %v2365_v22 = vld [vmem:[%s3166_s3 + $0x68] sm:$0xff] }
  0xd7   :  { %v315_v33 = vadd.f32 %v2691_v46, %v314_v27  ;;  %v694_v34 = vadd.f32 %v2691_v46, %v693_v28 }
  0xd8   :  { %2497 = vst [vmem:[%s3167_s6 + $0x10] sm:$0xff] %v2389_v26   ;;  %v1234_v37 = vmax.f32 %v1120_v31, 0.0  ;;  %v1613_v38 = vmax.f32 %v1499_v32, 0.0 }
  0xd9   :  { %v428_v43 = vmax.f32 %v315_v33, 0.0  ;;  %v807_v44 = vmax.f32 %v694_v34, 0.0 }
  0xda   :  { %v1662_v53 = vmax.f32 %v1234_v37, %v1613_v38 }
  0xdb   :  { %v856_v56 = vmax.f32 %v428_v43, %v807_v44 }
  0xdc   :  { %v1711_v58 = vmax.f32 %v855_v52, %v1662_v53 }
  0xdd   :  { %v1121_v39 = vpop.f32.mrf.mxu2  ;;  %v1500_v40 = vpop.f32.mrf.mxu3 }
  0xde   :  { %v1122_v45 = vadd.f32 %v2691_v46, %v1121_v39  ;;  %v1501_v47 = vadd.f32 %v2691_v46, %v1500_v40  ;;  %v317_v48 = vpop.f32.mrf.mxu0  ;;  %v696_v49 = vpop.f32.mrf.mxu1 }
  0xdf   :  { %v318_v1 = vadd.f32 %v2691_v46, %v317_v48  ;;  %v697_v2 = vadd.f32 %v2691_v46, %v696_v49  ;;  %v2294_v49 = vld [vmem:[%s3163_s0 + $0x70] sm:$0xff] }
  0xe0   :  { %v1235_v54 = vmax.f32 %v1122_v45, 0.0  ;;  %v1614_v55 = vmax.f32 %v1501_v47, 0.0 }
  0xe1   :  { %356 = vmatmul.bf16.gmra.mxu0 %v2292_v41  ;;  %735 = vmatmul.bf16.gmra.mxu1 %v2316_v42  ;;  %v429_v7 = vmax.f32 %v318_v1, 0.0  ;;  %v808_v8 = vmax.f32 %v697_v2, 0.0 }
  0xe2   :  { %v1663_v57 = vmax.f32 %v1235_v54, %v1614_v55  ;;  %1163 = vmatmul.bf16.gmra.mxu2 %v2340_v50  ;;  %1542 = vmatmul.bf16.gmra.mxu3 %v2364_v51  ;;  %v2318_v50 = vld [vmem:[%s3164_s1 + $0x70] sm:$0xff] }
  0xe3   :  { %v857_v23 = vmax.f32 %v429_v7, %v808_v8 }
  0xe4   :  { %v1712_v59 = vmax.f32 %v856_v56, %v1663_v57  ;;  %v2342_v57 = vld [vmem:[%s3165_s2 + $0x70] sm:$0xff] }
  0xe5   :  { %v1124_v60 = vpop.f32.mrf.mxu2  ;;  %v1503_v61 = vpop.f32.mrf.mxu3 }
  0xe6   :  { %v2394_v62 = vpack.c.bf16 %v1712_v59, %v1711_v58  ;;  %v319_v63 = vpop.f32.mrf.mxu0  ;;  %v698_v0 = vpop.f32.mrf.mxu1  ;;  %v1125_v3 = vadd.f32 %v2691_v46, %v1124_v60  ;;  %v1504_v4 = vadd.f32 %v2691_v46, %v1503_v61  ;;  %v2366_v58 = vld [vmem:[%s3166_s3 + $0x70] sm:$0xff] }
  0xe7   :  { %v320_v5 = vadd.f32 %v2691_v46, %v319_v63  ;;  %v699_v6 = vadd.f32 %v2691_v46, %v698_v0 }
  0xe8   :  { %2498 = vst [vmem:[%s3167_s6 + $0x18] sm:$0xff] %v2394_v62   ;;  %v1236_v9 = vmax.f32 %v1125_v3, 0.0  ;;  %v1615_v10 = vmax.f32 %v1504_v4, 0.0 }
  0xe9   :  { %v430_v15 = vmax.f32 %v320_v5, 0.0  ;;  %v809_v16 = vmax.f32 %v699_v6, 0.0 }
  0xea   :  { %v1664_v24 = vmax.f32 %v1236_v9, %v1615_v10 }
  0xeb   :  { %v858_v27 = vmax.f32 %v430_v15, %v809_v16 }
  0xec   :  { %v1713_v29 = vmax.f32 %v857_v23, %v1664_v24 }
  0xed   :  { %v1126_v11 = vpop.f32.mrf.mxu2  ;;  %v1505_v12 = vpop.f32.mrf.mxu3 }
  0xee   :  { %v1127_v17 = vadd.f32 %v2691_v46, %v1126_v11  ;;  %v1506_v18 = vadd.f32 %v2691_v46, %v1505_v12  ;;  %v322_v19 = vpop.f32.mrf.mxu0  ;;  %v701_v20 = vpop.f32.mrf.mxu1 }
  0xef   :  { %v323_v36 = vadd.f32 %v2691_v46, %v322_v19  ;;  %v702_v37 = vadd.f32 %v2691_v46, %v701_v20  ;;  %v2295_v20 = vld [vmem:[%s3163_s0 + $0x78] sm:$0xff] }
  0xf0   :  { %v1237_v25 = vmax.f32 %v1127_v17, 0.0  ;;  %v1616_v26 = vmax.f32 %v1506_v18, 0.0 }
  0xf1   :  { %361 = vmatmul.bf16.gmra.mxu0 %v2293_v13  ;;  %740 = vmatmul.bf16.gmra.mxu1 %v2317_v14  ;;  %v431_v42 = vmax.f32 %v323_v36, 0.0  ;;  %v810_v43 = vmax.f32 %v702_v37, 0.0 }
  0xf2   :  { %v1665_v28 = vmax.f32 %v1237_v25, %v1616_v26  ;;  %1168 = vmatmul.bf16.gmra.mxu2 %v2341_v21  ;;  %1547 = vmatmul.bf16.gmra.mxu3 %v2365_v22  ;;  %v2319_v21 = vld [vmem:[%s3164_s1 + $0x78] sm:$0xff] }
  0xf3   :  { %v859_v59 = vmax.f32 %v431_v42, %v810_v43 }
  0xf4   :  { %v1714_v30 = vmax.f32 %v858_v27, %v1665_v28  ;;  %v2343_v28 = vld [vmem:[%s3165_s2 + $0x78] sm:$0xff] }
  0xf5   :  { %v1129_v31 = vpop.f32.mrf.mxu2  ;;  %v1508_v32 = vpop.f32.mrf.mxu3 }
  0xf6   :  { %v2399_v33 = vpack.c.bf16 %v1714_v30, %v1713_v29  ;;  %v324_v34 = vpop.f32.mrf.mxu0  ;;  %v703_v35 = vpop.f32.mrf.mxu1  ;;  %v1130_v38 = vadd.f32 %v2691_v46, %v1129_v31  ;;  %v1509_v39 = vadd.f32 %v2691_v46, %v1508_v32  ;;  %v2367_v29 = vld [vmem:[%s3166_s3 + $0x78] sm:$0xff] }
  0xf7   :  { %v325_v40 = vadd.f32 %v2691_v46, %v324_v34  ;;  %v704_v41 = vadd.f32 %v2691_v46, %v703_v35 }
  0xf8   :  { %2499 = vst [vmem:[%s3167_s6 + $0x20] sm:$0xff] %v2399_v33   ;;  %v1238_v44 = vmax.f32 %v1130_v38, 0.0  ;;  %v1617_v45 = vmax.f32 %v1509_v39, 0.0 }
  0xf9   :  { %v432_v51 = vmax.f32 %v325_v40, 0.0  ;;  %v811_v52 = vmax.f32 %v704_v41, 0.0 }
  0xfa   :  { %v1666_v60 = vmax.f32 %v1238_v44, %v1617_v45 }
  0xfb   :  { %v860_v63 = vmax.f32 %v432_v51, %v811_v52 }
  0xfc   :  { %v1715_v1 = vmax.f32 %v859_v59, %v1666_v60 }
  0xfd   :  { %v1131_v47 = vpop.f32.mrf.mxu2  ;;  %v1510_v48 = vpop.f32.mrf.mxu3 }
  0xfe   :  { %v1132_v53 = vadd.f32 %v2691_v46, %v1131_v47  ;;  %v1511_v54 = vadd.f32 %v2691_v46, %v1510_v48  ;;  %v327_v55 = vpop.f32.mrf.mxu0  ;;  %v706_v56 = vpop.f32.mrf.mxu1 }
  0xff   :  { %v328_v8 = vadd.f32 %v2691_v46, %v327_v55  ;;  %v707_v9 = vadd.f32 %v2691_v46, %v706_v56  ;;  %v2296_v56 = vld [vmem:[%s3163_s0 + $0x80] sm:$0xff] }
 0x100   :  { %v1239_v61 = vmax.f32 %v1132_v53, 0.0  ;;  %v1618_v62 = vmax.f32 %v1511_v54, 0.0 }
 0x101   :  { %366 = vmatmul.bf16.gmra.mxu0 %v2294_v49  ;;  %745 = vmatmul.bf16.gmra.mxu1 %v2318_v50  ;;  %v433_v14 = vmax.f32 %v328_v8, 0.0  ;;  %v812_v15 = vmax.f32 %v707_v9, 0.0 }
 0x102   :  { %v1667_v0 = vmax.f32 %v1239_v61, %v1618_v62  ;;  %1173 = vmatmul.bf16.gmra.mxu2 %v2342_v57  ;;  %1552 = vmatmul.bf16.gmra.mxu3 %v2366_v58  ;;  %v2320_v57 = vld [vmem:[%s3164_s1 + $0x80] sm:$0xff] }
 0x103   :  { %v861_v30 = vmax.f32 %v433_v14, %v812_v15 }
 0x104   :  { %v1716_v2 = vmax.f32 %v860_v63, %v1667_v0  ;;  %v2344_v0 = vld [vmem:[%s3165_s2 + $0x80] sm:$0xff] }
 0x105   :  { %v1134_v3 = vpop.f32.mrf.mxu2  ;;  %v1513_v4 = vpop.f32.mrf.mxu3 }
 0x106   :  { %v2404_v5 = vpack.c.bf16 %v1716_v2, %v1715_v1  ;;  %v329_v6 = vpop.f32.mrf.mxu0  ;;  %v708_v7 = vpop.f32.mrf.mxu1  ;;  %v1135_v10 = vadd.f32 %v2691_v46, %v1134_v3  ;;  %v1514_v11 = vadd.f32 %v2691_v46, %v1513_v4  ;;  %v2368_v1 = vld [vmem:[%s3166_s3 + $0x80] sm:$0xff] }
 0x107   :  { %v330_v12 = vadd.f32 %v2691_v46, %v329_v6  ;;  %v709_v13 = vadd.f32 %v2691_v46, %v708_v7 }
 0x108   :  { %2500 = vst [vmem:[%s3167_s6 + $0x28] sm:$0xff] %v2404_v5   ;;  %v1240_v16 = vmax.f32 %v1135_v10, 0.0  ;;  %v1619_v17 = vmax.f32 %v1514_v11, 0.0 }
 0x109   :  { %v434_v22 = vmax.f32 %v330_v12, 0.0  ;;  %v813_v23 = vmax.f32 %v709_v13, 0.0 }
 0x10a   :  { %v1668_v31 = vmax.f32 %v1240_v16, %v1619_v17 }
 0x10b   :  { %v862_v34 = vmax.f32 %v434_v22, %v813_v23 }
 0x10c   :  { %v1717_v36 = vmax.f32 %v861_v30, %v1668_v31 }
 0x10d   :  { %v1136_v18 = vpop.f32.mrf.mxu2  ;;  %v1515_v19 = vpop.f32.mrf.mxu3 }
 0x10e   :  { %v1137_v24 = vadd.f32 %v2691_v46, %v1136_v18  ;;  %v1516_v25 = vadd.f32 %v2691_v46, %v1515_v19  ;;  %v332_v26 = vpop.f32.mrf.mxu0  ;;  %v711_v27 = vpop.f32.mrf.mxu1 }
 0x10f   :  { %v333_v43 = vadd.f32 %v2691_v46, %v332_v26  ;;  %v712_v44 = vadd.f32 %v2691_v46, %v711_v27  ;;  %v2297_v27 = vld [vmem:[%s3163_s0 + $0x88] sm:$0xff] }
 0x110   :  { %v1241_v32 = vmax.f32 %v1137_v24, 0.0  ;;  %v1620_v33 = vmax.f32 %v1516_v25, 0.0 }
 0x111   :  { %371 = vmatmul.bf16.gmra.mxu0 %v2295_v20  ;;  %750 = vmatmul.bf16.gmra.mxu1 %v2319_v21  ;;  %v435_v50 = vmax.f32 %v333_v43, 0.0  ;;  %v814_v51 = vmax.f32 %v712_v44, 0.0 }
 0x112   :  { %v1669_v35 = vmax.f32 %v1241_v32, %v1620_v33  ;;  %1178 = vmatmul.bf16.gmra.mxu2 %v2343_v28  ;;  %1557 = vmatmul.bf16.gmra.mxu3 %v2367_v29  ;;  %v2321_v28 = vld [vmem:[%s3164_s1 + $0x88] sm:$0xff] }
 0x113   :  { %v863_v2 = vmax.f32 %v435_v50, %v814_v51 }
 0x114   :  { %v1718_v37 = vmax.f32 %v862_v34, %v1669_v35  ;;  %v2345_v35 = vld [vmem:[%s3165_s2 + $0x88] sm:$0xff] }
 0x115   :  { %v1139_v38 = vpop.f32.mrf.mxu2  ;;  %v1518_v39 = vpop.f32.mrf.mxu3 }
 0x116   :  { %v2409_v40 = vpack.c.bf16 %v1718_v37, %v1717_v36  ;;  %v334_v41 = vpop.f32.mrf.mxu0  ;;  %v713_v42 = vpop.f32.mrf.mxu1  ;;  %v1140_v45 = vadd.f32 %v2691_v46, %v1139_v38  ;;  %v1519_v47 = vadd.f32 %v2691_v46, %v1518_v39  ;;  %v2369_v36 = vld [vmem:[%s3166_s3 + $0x88] sm:$0xff] }
 0x117   :  { %v335_v48 = vadd.f32 %v2691_v46, %v334_v41  ;;  %v714_v49 = vadd.f32 %v2691_v46, %v713_v42 }
 0x118   :  { %2501 = vst [vmem:[%s3167_s6 + $0x30] sm:$0xff] %v2409_v40   ;;  %v1242_v52 = vmax.f32 %v1140_v45, 0.0  ;;  %v1621_v53 = vmax.f32 %v1519_v47, 0.0 }
 0x119   :  { %v436_v58 = vmax.f32 %v335_v48, 0.0  ;;  %v815_v59 = vmax.f32 %v714_v49, 0.0 }
 0x11a   :  { %v1670_v3 = vmax.f32 %v1242_v52, %v1621_v53 }
 0x11b   :  { %v864_v6 = vmax.f32 %v436_v58, %v815_v59 }
 0x11c   :  { %v1719_v8 = vmax.f32 %v863_v2, %v1670_v3 }
 0x11d   :  { %v1141_v54 = vpop.f32.mrf.mxu2  ;;  %v1520_v55 = vpop.f32.mrf.mxu3 }
 0x11e   :  { %v1142_v60 = vadd.f32 %v2691_v46, %v1141_v54  ;;  %v1521_v61 = vadd.f32 %v2691_v46, %v1520_v55  ;;  %v337_v62 = vpop.f32.mrf.mxu0  ;;  %v716_v63 = vpop.f32.mrf.mxu1 }
 0x11f   :  { %v338_v15 = vadd.f32 %v2691_v46, %v337_v62  ;;  %v717_v16 = vadd.f32 %v2691_v46, %v716_v63  ;;  %v2298_v63 = vld [vmem:[%s3163_s0 + $0x90] sm:$0xff] }
 0x120   :  { %v1243_v4 = vmax.f32 %v1142_v60, 0.0  ;;  %v1622_v5 = vmax.f32 %v1521_v61, 0.0 }
 0x121   :  { %376 = vmatmul.bf16.gmra.mxu0 %v2296_v56  ;;  %755 = vmatmul.bf16.gmra.mxu1 %v2320_v57  ;;  %v437_v21 = vmax.f32 %v338_v15, 0.0  ;;  %v816_v22 = vmax.f32 %v717_v16, 0.0 }
 0x122   :  { %v1671_v7 = vmax.f32 %v1243_v4, %v1622_v5  ;;  %1183 = vmatmul.bf16.gmra.mxu2 %v2344_v0  ;;  %1562 = vmatmul.bf16.gmra.mxu3 %v2368_v1  ;;  %v2322_v0 = vld [vmem:[%s3164_s1 + $0x90] sm:$0xff] }
 0x123   :  { %v865_v37 = vmax.f32 %v437_v21, %v816_v22 }
 0x124   :  { %v1720_v9 = vmax.f32 %v864_v6, %v1671_v7  ;;  %v2346_v7 = vld [vmem:[%s3165_s2 + $0x90] sm:$0xff] }
 0x125   :  { %v1144_v10 = vpop.f32.mrf.mxu2  ;;  %v1523_v11 = vpop.f32.mrf.mxu3 }
 0x126   :  { %v2414_v12 = vpack.c.bf16 %v1720_v9, %v1719_v8  ;;  %v339_v13 = vpop.f32.mrf.mxu0  ;;  %v718_v14 = vpop.f32.mrf.mxu1  ;;  %v1145_v17 = vadd.f32 %v2691_v46, %v1144_v10  ;;  %v1524_v18 = vadd.f32 %v2691_v46, %v1523_v11  ;;  %v2370_v8 = vld [vmem:[%s3166_s3 + $0x90] sm:$0xff] }
 0x127   :  { %v340_v19 = vadd.f32 %v2691_v46, %v339_v13  ;;  %v719_v20 = vadd.f32 %v2691_v46, %v718_v14 }
 0x128   :  { %2502 = vst [vmem:[%s3167_s6 + $0x38] sm:$0xff] %v2414_v12   ;;  %v1244_v23 = vmax.f32 %v1145_v17, 0.0  ;;  %v1623_v24 = vmax.f32 %v1524_v18, 0.0 }
 0x129   :  { %v438_v29 = vmax.f32 %v340_v19, 0.0  ;;  %v817_v30 = vmax.f32 %v719_v20, 0.0 }
 0x12a   :  { %v1672_v38 = vmax.f32 %v1244_v23, %v1623_v24 }
 0x12b   :  { %v866_v41 = vmax.f32 %v438_v29, %v817_v30 }
 0x12c   :  { %v1721_v43 = vmax.f32 %v865_v37, %v1672_v38 }
 0x12d   :  { %v1146_v25 = vpop.f32.mrf.mxu2  ;;  %v1525_v26 = vpop.f32.mrf.mxu3 }
 0x12e   :  { %v1147_v31 = vadd.f32 %v2691_v46, %v1146_v25  ;;  %v1526_v32 = vadd.f32 %v2691_v46, %v1525_v26  ;;  %v342_v33 = vpop.f32.mrf.mxu0  ;;  %v721_v34 = vpop.f32.mrf.mxu1 }
 0x12f   :  { %v343_v51 = vadd.f32 %v2691_v46, %v342_v33  ;;  %v722_v52 = vadd.f32 %v2691_v46, %v721_v34  ;;  %v2299_v34 = vld [vmem:[%s3163_s0 + $0x98] sm:$0xff] }
 0x130   :  { %v1245_v39 = vmax.f32 %v1147_v31, 0.0  ;;  %v1624_v40 = vmax.f32 %v1526_v32, 0.0 }
 0x131   :  { %381 = vmatmul.bf16.gmra.mxu0 %v2297_v27  ;;  %760 = vmatmul.bf16.gmra.mxu1 %v2321_v28  ;;  %v439_v57 = vmax.f32 %v343_v51, 0.0  ;;  %v818_v58 = vmax.f32 %v722_v52, 0.0 }
 0x132   :  { %v1673_v42 = vmax.f32 %v1245_v39, %v1624_v40  ;;  %1188 = vmatmul.bf16.gmra.mxu2 %v2345_v35  ;;  %1567 = vmatmul.bf16.gmra.mxu3 %v2369_v36  ;;  %v2323_v35 = vld [vmem:[%s3164_s1 + $0x98] sm:$0xff] }
 0x133   :  { %v867_v9 = vmax.f32 %v439_v57, %v818_v58 }
 0x134   :  { %v1722_v44 = vmax.f32 %v866_v41, %v1673_v42  ;;  %v2347_v42 = vld [vmem:[%s3165_s2 + $0x98] sm:$0xff] }
 0x135   :  { %v1149_v45 = vpop.f32.mrf.mxu2  ;;  %v1528_v47 = vpop.f32.mrf.mxu3 }
 0x136   :  { %v2419_v48 = vpack.c.bf16 %v1722_v44, %v1721_v43  ;;  %v344_v49 = vpop.f32.mrf.mxu0  ;;  %v723_v50 = vpop.f32.mrf.mxu1  ;;  %v1150_v53 = vadd.f32 %v2691_v46, %v1149_v45  ;;  %v1529_v54 = vadd.f32 %v2691_v46, %v1528_v47  ;;  %v2371_v43 = vld [vmem:[%s3166_s3 + $0x98] sm:$0xff] }
 0x137   :  { %v345_v55 = vadd.f32 %v2691_v46, %v344_v49  ;;  %v724_v56 = vadd.f32 %v2691_v46, %v723_v50 }
 0x138   :  { %2503 = vst [vmem:[%s3167_s6 + $0x40] sm:$0xff] %v2419_v48   ;;  %v1246_v59 = vmax.f32 %v1150_v53, 0.0  ;;  %v1625_v60 = vmax.f32 %v1529_v54, 0.0 }
 0x139   :  { %v440_v1 = vmax.f32 %v345_v55, 0.0  ;;  %v819_v2 = vmax.f32 %v724_v56, 0.0 }
 0x13a   :  { %v1674_v10 = vmax.f32 %v1246_v59, %v1625_v60 }
 0x13b   :  { %v868_v13 = vmax.f32 %v440_v1, %v819_v2 }
 0x13c   :  { %v1723_v15 = vmax.f32 %v867_v9, %v1674_v10 }
 0x13d   :  { %v1151_v61 = vpop.f32.mrf.mxu2  ;;  %v1530_v62 = vpop.f32.mrf.mxu3 }
 0x13e   :  { %v1152_v3 = vadd.f32 %v2691_v46, %v1151_v61  ;;  %v1531_v4 = vadd.f32 %v2691_v46, %v1530_v62  ;;  %v347_v5 = vpop.f32.mrf.mxu0  ;;  %v726_v6 = vpop.f32.mrf.mxu1 }
 0x13f   :  { %v348_v22 = vadd.f32 %v2691_v46, %v347_v5  ;;  %v727_v23 = vadd.f32 %v2691_v46, %v726_v6  ;;  %v2300_v6 = vld [vmem:[%s3163_s0 + $0xa0] sm:$0xff] }
 0x140   :  { %v1247_v11 = vmax.f32 %v1152_v3, 0.0  ;;  %v1626_v12 = vmax.f32 %v1531_v4, 0.0 }
 0x141   :  { %386 = vmatmul.bf16.gmra.mxu0 %v2298_v63  ;;  %765 = vmatmul.bf16.gmra.mxu1 %v2322_v0  ;;  %v441_v28 = vmax.f32 %v348_v22, 0.0  ;;  %v820_v29 = vmax.f32 %v727_v23, 0.0 }
 0x142   :  { %v1675_v14 = vmax.f32 %v1247_v11, %v1626_v12  ;;  %1193 = vmatmul.bf16.gmra.mxu2 %v2346_v7  ;;  %1572 = vmatmul.bf16.gmra.mxu3 %v2370_v8  ;;  %v2324_v7 = vld [vmem:[%s3164_s1 + $0xa0] sm:$0xff] }
 0x143   :  { %v869_v44 = vmax.f32 %v441_v28, %v820_v29 }
 0x144   :  { %v1724_v16 = vmax.f32 %v868_v13, %v1675_v14  ;;  %v2348_v14 = vld [vmem:[%s3165_s2 + $0xa0] sm:$0xff] }
 0x145   :  { %v1154_v17 = vpop.f32.mrf.mxu2  ;;  %v1533_v18 = vpop.f32.mrf.mxu3 }
 0x146   :  { %v2424_v19 = vpack.c.bf16 %v1724_v16, %v1723_v15  ;;  %v349_v20 = vpop.f32.mrf.mxu0  ;;  %v728_v21 = vpop.f32.mrf.mxu1  ;;  %v1155_v24 = vadd.f32 %v2691_v46, %v1154_v17  ;;  %v1534_v25 = vadd.f32 %v2691_v46, %v1533_v18  ;;  %v2372_v15 = vld [vmem:[%s3166_s3 + $0xa0] sm:$0xff] }
 0x147   :  { %v350_v26 = vadd.f32 %v2691_v46, %v349_v20  ;;  %v729_v27 = vadd.f32 %v2691_v46, %v728_v21 }
 0x148   :  { %2504 = vst [vmem:[%s3167_s6 + $0x48] sm:$0xff] %v2424_v19   ;;  %v1248_v30 = vmax.f32 %v1155_v24, 0.0  ;;  %v1627_v31 = vmax.f32 %v1534_v25, 0.0 }
 0x149   :  { %v442_v36 = vmax.f32 %v350_v26, 0.0  ;;  %v821_v37 = vmax.f32 %v729_v27, 0.0 }
 0x14a   :  { %v1676_v45 = vmax.f32 %v1248_v30, %v1627_v31 }
 0x14b   :  { %v870_v49 = vmax.f32 %v442_v36, %v821_v37 }
 0x14c   :  { %v1725_v51 = vmax.f32 %v869_v44, %v1676_v45 }
 0x14d   :  { %v1156_v32 = vpop.f32.mrf.mxu2  ;;  %v1535_v33 = vpop.f32.mrf.mxu3 }
 0x14e   :  { %v1157_v38 = vadd.f32 %v2691_v46, %v1156_v32  ;;  %v1536_v39 = vadd.f32 %v2691_v46, %v1535_v33  ;;  %v352_v40 = vpop.f32.mrf.mxu0  ;;  %v731_v41 = vpop.f32.mrf.mxu1 }
 0x14f   :  { %v353_v58 = vadd.f32 %v2691_v46, %v352_v40  ;;  %v732_v59 = vadd.f32 %v2691_v46, %v731_v41  ;;  %v2301_v41 = vld [vmem:[%s3163_s0 + $0xa8] sm:$0xff] }
 0x150   :  { %v1249_v47 = vmax.f32 %v1157_v38, 0.0  ;;  %v1628_v48 = vmax.f32 %v1536_v39, 0.0 }
 0x151   :  { %391 = vmatmul.bf16.gmra.mxu0 %v2299_v34  ;;  %770 = vmatmul.bf16.gmra.mxu1 %v2323_v35  ;;  %v443_v0 = vmax.f32 %v353_v58, 0.0  ;;  %v822_v1 = vmax.f32 %v732_v59, 0.0 }
 0x152   :  { %v1677_v50 = vmax.f32 %v1249_v47, %v1628_v48  ;;  %1198 = vmatmul.bf16.gmra.mxu2 %v2347_v42  ;;  %1577 = vmatmul.bf16.gmra.mxu3 %v2371_v43  ;;  %v2325_v42 = vld [vmem:[%s3164_s1 + $0xa8] sm:$0xff] }
 0x153   :  { %v871_v16 = vmax.f32 %v443_v0, %v822_v1  ;;  %v2995_v0 = vld [vmem:[%s3162_s5] ss:$0 sm:$0xff] }
 0x154   :  { %v1726_v52 = vmax.f32 %v870_v49, %v1677_v50  ;;  %v2349_v50 = vld [vmem:[%s3165_s2 + $0xa8] sm:$0xff] }
 0x155   :  { %v1159_v53 = vpop.f32.mrf.mxu2  ;;  %v1538_v54 = vpop.f32.mrf.mxu3 }
 0x156   :  { %v2429_v55 = vpack.c.bf16 %v1726_v52, %v1725_v51  ;;  %v354_v56 = vpop.f32.mrf.mxu0  ;;  %v733_v57 = vpop.f32.mrf.mxu1  ;;  %v1160_v60 = vadd.f32 %v2691_v46, %v1159_v53  ;;  %v1539_v61 = vadd.f32 %v2691_v46, %v1538_v54  ;;  %v2373_v51 = vld [vmem:[%s3166_s3 + $0xa8] sm:$0xff] }
 0x157   :  { %v355_v62 = vadd.f32 %v2691_v46, %v354_v56  ;;  %v734_v63 = vadd.f32 %v2691_v46, %v733_v57 }
 0x158   :  { %2505 = vst [vmem:[%s3167_s6 + $0x50] sm:$0xff] %v2429_v55   ;;  %v1250_v2 = vmax.f32 %v1160_v60, 0.0  ;;  %v1629_v3 = vmax.f32 %v1539_v61, 0.0 }
 0x159   :  { %v444_v8 = vmax.f32 %v355_v62, 0.0  ;;  %v823_v9 = vmax.f32 %v734_v63, 0.0 }
 0x15a   :  { %v1678_v17 = vmax.f32 %v1250_v2, %v1629_v3 }
 0x15b   :  { %v872_v20 = vmax.f32 %v444_v8, %v823_v9 }
 0x15c   :  { %v1727_v22 = vmax.f32 %v871_v16, %v1678_v17 }
 0x15d   :  { %v1161_v4 = vpop.f32.mrf.mxu2  ;;  %v1540_v5 = vpop.f32.mrf.mxu3 }
 0x15e   :  { %v1162_v10 = vadd.f32 %v2691_v46, %v1161_v4  ;;  %v1541_v11 = vadd.f32 %v2691_v46, %v1540_v5  ;;  %v357_v12 = vpop.f32.mrf.mxu0  ;;  %v736_v13 = vpop.f32.mrf.mxu1 }
 0x15f   :  { %v358_v29 = vadd.f32 %v2691_v46, %v357_v12  ;;  %v737_v30 = vadd.f32 %v2691_v46, %v736_v13  ;;  %v2302_v13 = vld [vmem:[%s3163_s0 + $0xb0] sm:$0xff] }
 0x160   :  { %v1251_v18 = vmax.f32 %v1162_v10, 0.0  ;;  %v1630_v19 = vmax.f32 %v1541_v11, 0.0 }
 0x161   :  { %396 = vmatmul.bf16.gmra.mxu0 %v2300_v6  ;;  %775 = vmatmul.bf16.gmra.mxu1 %v2324_v7  ;;  %v445_v35 = vmax.f32 %v358_v29, 0.0  ;;  %v824_v36 = vmax.f32 %v737_v30, 0.0 }
 0x162   :  { %v1679_v21 = vmax.f32 %v1251_v18, %v1630_v19  ;;  %1203 = vmatmul.bf16.gmra.mxu2 %v2348_v14  ;;  %1582 = vmatmul.bf16.gmra.mxu3 %v2372_v15  ;;  %v2326_v14 = vld [vmem:[%s3164_s1 + $0xb0] sm:$0xff] }
 0x163   :  { %v873_v52 = vmax.f32 %v445_v35, %v824_v36 }
 0x164   :  { %v1728_v23 = vmax.f32 %v872_v20, %v1679_v21  ;;  %v2350_v21 = vld [vmem:[%s3165_s2 + $0xb0] sm:$0xff] }
 0x165   :  { %v1164_v24 = vpop.f32.mrf.mxu2  ;;  %v1543_v25 = vpop.f32.mrf.mxu3 }
 0x166   :  { %v2434_v26 = vpack.c.bf16 %v1728_v23, %v1727_v22  ;;  %v359_v27 = vpop.f32.mrf.mxu0  ;;  %v738_v28 = vpop.f32.mrf.mxu1  ;;  %v1165_v31 = vadd.f32 %v2691_v46, %v1164_v24  ;;  %v1544_v32 = vadd.f32 %v2691_v46, %v1543_v25  ;;  %v2374_v22 = vld [vmem:[%s3166_s3 + $0xb0] sm:$0xff] }
 0x167   :  { %v360_v33 = vadd.f32 %v2691_v46, %v359_v27  ;;  %v739_v34 = vadd.f32 %v2691_v46, %v738_v28 }
 0x168   :  { %2506 = vst [vmem:[%s3167_s6 + $0x58] sm:$0xff] %v2434_v26   ;;  %v1252_v37 = vmax.f32 %v1165_v31, 0.0  ;;  %v1631_v38 = vmax.f32 %v1544_v32, 0.0 }
 0x169   :  { %v446_v43 = vmax.f32 %v360_v33, 0.0  ;;  %v825_v44 = vmax.f32 %v739_v34, 0.0 }
 0x16a   :  { %v1680_v53 = vmax.f32 %v1252_v37, %v1631_v38 }
 0x16b   :  { %v874_v56 = vmax.f32 %v446_v43, %v825_v44 }
 0x16d   :  { %v1166_v39 = vpop.f32.mrf.mxu2  ;;  %v1545_v40 = vpop.f32.mrf.mxu3 }
 0x16e   :  { %v1167_v45 = vadd.f32 %v2691_v46, %v1166_v39  ;;  %v1546_v47 = vadd.f32 %v2691_v46, %v1545_v40  ;;  %v362_v48 = vpop.f32.mrf.mxu0  ;;  %v741_v49 = vpop.f32.mrf.mxu1  ;;  %v1729_v46 = vmax.f32 %v873_v52, %v1680_v53 }
 0x16f   :  { %v363_v1 = vadd.f32 %v2995_v0, %v362_v48  ;;  %v742_v2 = vadd.f32 %v2995_v0, %v741_v49  ;;  %v2303_v49 = vld [vmem:[%s3163_s0 + $0xb8] sm:$0xff] }
 0x170   :  { %v1253_v54 = vmax.f32 %v1167_v45, 0.0  ;;  %v1632_v55 = vmax.f32 %v1546_v47, 0.0 }
 0x171   :  { %401 = vmatmul.bf16.gmra.mxu0 %v2301_v41  ;;  %780 = vmatmul.bf16.gmra.mxu1 %v2325_v42  ;;  %v447_v7 = vmax.f32 %v363_v1, 0.0  ;;  %v826_v8 = vmax.f32 %v742_v2, 0.0 }
 0x172   :  { %v1681_v57 = vmax.f32 %v1253_v54, %v1632_v55  ;;  %1208 = vmatmul.bf16.gmra.mxu2 %v2349_v50  ;;  %1587 = vmatmul.bf16.gmra.mxu3 %v2373_v51  ;;  %v2327_v50 = vld [vmem:[%s3164_s1 + $0xb8] sm:$0xff] }
 0x173   :  { %v875_v23 = vmax.f32 %v447_v7, %v826_v8 }
 0x174   :  { %v1730_v58 = vmax.f32 %v874_v56, %v1681_v57  ;;  %v2351_v57 = vld [vmem:[%s3165_s2 + $0xb8] sm:$0xff] }
 0x175   :  { %v1169_v59 = vpop.f32.mrf.mxu2  ;;  %v1548_v60 = vpop.f32.mrf.mxu3 }
 0x176   :  { %v2439_v61 = vpack.c.bf16 %v1730_v58, %v1729_v46  ;;  %v364_v62 = vpop.f32.mrf.mxu0  ;;  %v743_v63 = vpop.f32.mrf.mxu1  ;;  %v1170_v3 = vadd.f32 %v2995_v0, %v1169_v59  ;;  %v1549_v4 = vadd.f32 %v2995_v0, %v1548_v60  ;;  %v2375_v46 = vld [vmem:[%s3166_s3 + $0xb8] sm:$0xff] }
 0x177   :  { %v365_v5 = vadd.f32 %v2995_v0, %v364_v62  ;;  %v744_v6 = vadd.f32 %v2995_v0, %v743_v63 }
 0x178   :  { %2507 = vst [vmem:[%s3167_s6 + $0x60] sm:$0xff] %v2439_v61   ;;  %v1254_v9 = vmax.f32 %v1170_v3, 0.0  ;;  %v1633_v10 = vmax.f32 %v1549_v4, 0.0 }
 0x179   :  { %v448_v15 = vmax.f32 %v365_v5, 0.0  ;;  %v827_v16 = vmax.f32 %v744_v6, 0.0  ;;  %v88_v5 = vld [vmem:[%s3163_s0 + $0xc0] sm:$0xf] }
 0x17a   :  { %v1682_v24 = vmax.f32 %v1254_v9, %v1633_v10  ;;  %v518_v9 = vld [vmem:[%s3164_s1 + $0xc0] sm:$0xf] }
 0x17b   :  { %v876_v27 = vmax.f32 %v448_v15, %v827_v16  ;;  %v946_v10 = vld [vmem:[%s3165_s2 + $0xc0] sm:$0xf]  ;;  %v189_v16 = vunpack.c.l.b16 %v88_v5 }
 0x17c   :  { %v1731_v29 = vmax.f32 %v875_v23, %v1682_v24 }
 0x17d   :  { %v1171_v11 = vpop.f32.mrf.mxu2  ;;  %v1550_v12 = vpop.f32.mrf.mxu3 }
 0x17e   :  { %v1172_v17 = vadd.f32 %v2995_v0, %v1171_v11  ;;  %v1551_v18 = vadd.f32 %v2995_v0, %v1550_v12  ;;  %v367_v19 = vpop.f32.mrf.mxu0  ;;  %v746_v20 = vpop.f32.mrf.mxu1  ;;  %v1325_v11 = vld [vmem:[%s3166_s3 + $0xc0] sm:$0xf] }
 0x17f   :  { %v368_v36 = vadd.f32 %v2995_v0, %v367_v19  ;;  %v747_v37 = vadd.f32 %v2995_v0, %v746_v20  ;;  %v1423_v19 = vunpack.c.l.b16 %v1325_v11 }
 0x180   :  { %v1255_v25 = vmax.f32 %v1172_v17, 0.0  ;;  %v1634_v26 = vmax.f32 %v1551_v18, 0.0  ;;  %v616_v17 = vunpack.c.l.b16 %v518_v9  ;;  %v1044_v18 = vunpack.c.l.b16 %v946_v10 }
 0x181   :  { %406 = vmatmul.bf16.gmra.mxu0 %v2302_v13  ;;  %785 = vmatmul.bf16.gmra.mxu1 %v2326_v14  ;;  %v449_v42 = vmax.f32 %v368_v36, 0.0  ;;  %v828_v43 = vmax.f32 %v747_v37, 0.0 }
 0x182   :  { %v1683_v28 = vmax.f32 %v1255_v25, %v1634_v26  ;;  %1213 = vmatmul.bf16.gmra.mxu2 %v2350_v21  ;;  %1592 = vmatmul.bf16.gmra.mxu3 %v2374_v22 }
 0x183   :  { %v877_v58 = vmax.f32 %v449_v42, %v828_v43 }
 0x184   :  { %v1732_v30 = vmax.f32 %v876_v27, %v1683_v28  ;;  %v214_v28 = vpack.c.b16 %v189_v16, %v189_v16 }
 0x185   :  { %v1174_v31 = vpop.f32.mrf.mxu2  ;;  %v1553_v32 = vpop.f32.mrf.mxu3 }
 0x186   :  { %v2444_v33 = vpack.c.bf16 %v1732_v30, %v1731_v29  ;;  %v369_v34 = vpop.f32.mrf.mxu0  ;;  %v748_v35 = vpop.f32.mrf.mxu1  ;;  %v1175_v38 = vadd.f32 %v2995_v0, %v1174_v31  ;;  %v1554_v39 = vadd.f32 %v2995_v0, %v1553_v32  ;;  %v641_v29 = vpack.c.b16 %v616_v17, %v616_v17 }
 0x187   :  { %v370_v40 = vadd.f32 %v2995_v0, %v369_v34  ;;  %v749_v41 = vadd.f32 %v2995_v0, %v748_v35  ;;  %v1069_v30 = vpack.c.b16 %v1044_v18, %v1044_v18  ;;  %v1448_v31 = vpack.c.b16 %v1423_v19, %v1423_v19 }
 0x188   :  { %2508 = vst [vmem:[%s3167_s6 + $0x68] sm:$0xff] %v2444_v33   ;;  %v1256_v44 = vmax.f32 %v1175_v38, 0.0  ;;  %v1635_v45 = vmax.f32 %v1554_v39, 0.0 }
 0x189   :  { %v450_v51 = vmax.f32 %v370_v40, 0.0  ;;  %v829_v52 = vmax.f32 %v749_v41, 0.0 }
 0x18a   :  { %v1684_v59 = vmax.f32 %v1256_v44, %v1635_v45 }
 0x18b   :  { %v878_v62 = vmax.f32 %v450_v51, %v829_v52 }
 0x18c   :  { %v1733_v1 = vmax.f32 %v877_v58, %v1684_v59 }
 0x18d   :  { %v1176_v47 = vpop.f32.mrf.mxu2  ;;  %v1555_v48 = vpop.f32.mrf.mxu3 }
 0x18e   :  { %v1177_v53 = vadd.f32 %v2995_v0, %v1176_v47  ;;  %v1556_v54 = vadd.f32 %v2995_v0, %v1555_v48  ;;  %v372_v55 = vpop.f32.mrf.mxu0  ;;  %v751_v56 = vpop.f32.mrf.mxu1 }
 0x18f   :  { %v373_v12 = vadd.f32 %v2995_v0, %v372_v55  ;;  %v752_v13 = vadd.f32 %v2995_v0, %v751_v56 }
 0x190   :  { %v1257_v60 = vmax.f32 %v1177_v53, 0.0  ;;  %v1636_v61 = vmax.f32 %v1556_v54, 0.0 }
 0x191   :  { %411 = vmatmul.bf16.gmra.mxu0 %v2303_v49  ;;  %790 = vmatmul.bf16.gmra.mxu1 %v2327_v50  ;;  %v451_v22 = vmax.f32 %v373_v12, 0.0  ;;  %v830_v23 = vmax.f32 %v752_v13, 0.0 }
 0x192   :  { %v1685_v63 = vmax.f32 %v1257_v60, %v1636_v61  ;;  %1218 = vmatmul.bf16.gmra.mxu2 %v2351_v57  ;;  %1597 = vmatmul.bf16.gmra.mxu3 %v2375_v46 }
 0x193   :  { %v879_v38 = vmax.f32 %v451_v22, %v830_v23 }
 0x194   :  { %v1734_v2 = vmax.f32 %v878_v62, %v1685_v63 }
 0x195   :  { %v1179_v3 = vpop.f32.mrf.mxu2  ;;  %v1558_v4 = vpop.f32.mrf.mxu3 }
 0x196   :  { %v2449_v6 = vpack.c.bf16 %v1734_v2, %v1733_v1  ;;  %v374_v7 = vpop.f32.mrf.mxu0  ;;  %v753_v8 = vpop.f32.mrf.mxu1  ;;  %v1180_v14 = vadd.f32 %v2995_v0, %v1179_v3  ;;  %v1559_v15 = vadd.f32 %v2995_v0, %v1558_v4 }
 0x197   :  { %v375_v20 = vadd.f32 %v2995_v0, %v374_v7  ;;  %v754_v21 = vadd.f32 %v2995_v0, %v753_v8 }
 0x198   :  { %2509 = vst [vmem:[%s3167_s6 + $0x70] sm:$0xff] %v2449_v6   ;;  %v1258_v24 = vmax.f32 %v1180_v14, 0.0  ;;  %v1637_v25 = vmax.f32 %v1559_v15, 0.0 }
 0x199   :  { %v452_v32 = vmax.f32 %v375_v20, 0.0  ;;  %v831_v33 = vmax.f32 %v754_v21, 0.0 }
 0x19a   :  { %v1686_v39 = vmax.f32 %v1258_v24, %v1637_v25 }
 0x19b   :  { %v880_v42 = vmax.f32 %v452_v32, %v831_v33 }
 0x19c   :  { %v1735_v44 = vmax.f32 %v879_v38, %v1686_v39 }
 0x19d   :  { %v1181_v26 = vpop.f32.mrf.mxu2  ;;  %v1560_v27 = vpop.f32.mrf.mxu3 }
 0x19e   :  { %v1182_v34 = vadd.f32 %v2995_v0, %v1181_v26  ;;  %v1561_v35 = vadd.f32 %v2995_v0, %v1560_v27  ;;  %v377_v36 = vpop.f32.mrf.mxu0  ;;  %v756_v37 = vpop.f32.mrf.mxu1 }
 0x19f   :  { %v378_v52 = vadd.f32 %v2995_v0, %v377_v36  ;;  %v757_v53 = vadd.f32 %v2995_v0, %v756_v37 }
 0x1a0   :  { %v1259_v40 = vmax.f32 %v1182_v34, 0.0  ;;  %v1638_v41 = vmax.f32 %v1561_v35, 0.0 }
 0x1a1   :  { %416 = vmatmul.bf16.gmra.mxu0 %v214_v28  ;;  %795 = vmatmul.bf16.gmra.mxu1 %v641_v29  ;;  %v453_v46 = vmax.f32 %v378_v52, 0.0  ;;  %v832_v58 = vmax.f32 %v757_v53, 0.0 }
 0x1a2   :  { %v1687_v43 = vmax.f32 %v1259_v40, %v1638_v41  ;;  %1223 = vmatmul.bf16.gmra.mxu2 %v1069_v30  ;;  %1602 = vmatmul.bf16.gmra.mxu3 %v1448_v31 }
 0x1a3   :  { %v881_v6 = vmax.f32 %v453_v46, %v832_v58 }
 0x1a4   :  { %v1736_v45 = vmax.f32 %v880_v42, %v1687_v43 }
 0x1a5   :  { %v1184_v47 = vpop.f32.mrf.mxu2  ;;  %v1563_v48 = vpop.f32.mrf.mxu3 }
 0x1a6   :  { %v2454_v49 = vpack.c.bf16 %v1736_v45, %v1735_v44  ;;  %v379_v50 = vpop.f32.mrf.mxu0  ;;  %v758_v51 = vpop.f32.mrf.mxu1  ;;  %v1185_v54 = vadd.f32 %v2995_v0, %v1184_v47  ;;  %v1564_v55 = vadd.f32 %v2995_v0, %v1563_v48 }
 0x1a7   :  { %v380_v56 = vadd.f32 %v2995_v0, %v379_v50  ;;  %v759_v57 = vadd.f32 %v2995_v0, %v758_v51 }
 0x1a8   :  { %2510 = vst [vmem:[%s3167_s6 + $0x78] sm:$0xff] %v2454_v49   ;;  %v1260_v59 = vmax.f32 %v1185_v54, 0.0  ;;  %v1639_v60 = vmax.f32 %v1564_v55, 0.0 }
 0x1a9   :  { %v454_v63 = vmax.f32 %v380_v56, 0.0  ;;  %v833_v1 = vmax.f32 %v759_v57, 0.0 }
 0x1aa   :  { %v1688_v7 = vmax.f32 %v1260_v59, %v1639_v60 }
 0x1ab   :  { %v882_v10 = vmax.f32 %v454_v63, %v833_v1 }
 0x1ac   :  { %v1737_v12 = vmax.f32 %v881_v6, %v1688_v7 }
 0x1ad   :  { %v1186_v61 = vpop.f32.mrf.mxu2  ;;  %v1565_v62 = vpop.f32.mrf.mxu3 }
 0x1ae   :  { %v1187_v2 = vadd.f32 %v2995_v0, %v1186_v61  ;;  %v1566_v3 = vadd.f32 %v2995_v0, %v1565_v62  ;;  %v382_v4 = vpop.f32.mrf.mxu0  ;;  %v761_v5 = vpop.f32.mrf.mxu1 }
 0x1af   :  { %v383_v19 = vadd.f32 %v2995_v0, %v382_v4  ;;  %v762_v20 = vadd.f32 %v2995_v0, %v761_v5 }
 0x1b0   :  { %v1261_v8 = vmax.f32 %v1187_v2, 0.0  ;;  %v1640_v9 = vmax.f32 %v1566_v3, 0.0 }
 0x1b1   :  { %v455_v25 = vmax.f32 %v383_v19, 0.0  ;;  %v834_v26 = vmax.f32 %v762_v20, 0.0 }
 0x1b2   :  { %v1689_v11 = vmax.f32 %v1261_v8, %v1640_v9 }
 0x1b3   :  { %v883_v37 = vmax.f32 %v455_v25, %v834_v26 }
 0x1b4   :  { %v1738_v13 = vmax.f32 %v882_v10, %v1689_v11 }
 0x1b5   :  { %v1189_v14 = vpop.f32.mrf.mxu2  ;;  %v1568_v15 = vpop.f32.mrf.mxu3 }
 0x1b6   :  { %v2459_v16 = vpack.c.bf16 %v1738_v13, %v1737_v12  ;;  %v384_v17 = vpop.f32.mrf.mxu0  ;;  %v763_v18 = vpop.f32.mrf.mxu1  ;;  %v1190_v21 = vadd.f32 %v2995_v0, %v1189_v14  ;;  %v1569_v22 = vadd.f32 %v2995_v0, %v1568_v15 }
 0x1b7   :  { %v385_v23 = vadd.f32 %v2995_v0, %v384_v17  ;;  %v764_v24 = vadd.f32 %v2995_v0, %v763_v18 }
 0x1b8   :  { %2511 = vst [vmem:[%s3167_s6 + $0x80] sm:$0xff] %v2459_v16   ;;  %v1262_v27 = vmax.f32 %v1190_v21, 0.0  ;;  %v1641_v28 = vmax.f32 %v1569_v22, 0.0 }
 0x1b9   :  { %v456_v31 = vmax.f32 %v385_v23, 0.0  ;;  %v835_v32 = vmax.f32 %v764_v24, 0.0 }
 0x1ba   :  { %v1690_v38 = vmax.f32 %v1262_v27, %v1641_v28 }
 0x1bb   :  { %v884_v41 = vmax.f32 %v456_v31, %v835_v32 }
 0x1bc   :  { %v1739_v43 = vmax.f32 %v883_v37, %v1690_v38 }
 0x1bd   :  { %v1191_v29 = vpop.f32.mrf.mxu2  ;;  %v1570_v30 = vpop.f32.mrf.mxu3 }
 0x1be   :  { %v1192_v33 = vadd.f32 %v2995_v0, %v1191_v29  ;;  %v1571_v34 = vadd.f32 %v2995_v0, %v1570_v30  ;;  %v387_v35 = vpop.f32.mrf.mxu0  ;;  %v766_v36 = vpop.f32.mrf.mxu1 }
 0x1bf   :  { %v388_v51 = vadd.f32 %v2995_v0, %v387_v35  ;;  %v767_v52 = vadd.f32 %v2995_v0, %v766_v36 }
 0x1c0   :  { %v1263_v39 = vmax.f32 %v1192_v33, 0.0  ;;  %v1642_v40 = vmax.f32 %v1571_v34, 0.0 }
 0x1c1   :  { %v457_v57 = vmax.f32 %v388_v51, 0.0  ;;  %v836_v46 = vmax.f32 %v767_v52, 0.0 }
 0x1c2   :  { %v1691_v42 = vmax.f32 %v1263_v39, %v1642_v40 }
 0x1c3   :  { %v885_v5 = vmax.f32 %v457_v57, %v836_v46 }
 0x1c4   :  { %v1740_v44 = vmax.f32 %v884_v41, %v1691_v42 }
 0x1c5   :  { %v1194_v45 = vpop.f32.mrf.mxu2  ;;  %v1573_v47 = vpop.f32.mrf.mxu3 }
 0x1c6   :  { %v2464_v48 = vpack.c.bf16 %v1740_v44, %v1739_v43  ;;  %v389_v49 = vpop.f32.mrf.mxu0  ;;  %v768_v50 = vpop.f32.mrf.mxu1  ;;  %v1195_v53 = vadd.f32 %v2995_v0, %v1194_v45  ;;  %v1574_v54 = vadd.f32 %v2995_v0, %v1573_v47 }
 0x1c7   :  { %v390_v55 = vadd.f32 %v2995_v0, %v389_v49  ;;  %v769_v56 = vadd.f32 %v2995_v0, %v768_v50 }
 0x1c8   :  { %2512 = vst [vmem:[%s3167_s6 + $0x88] sm:$0xff] %v2464_v48   ;;  %v1264_v58 = vmax.f32 %v1195_v53, 0.0  ;;  %v1643_v59 = vmax.f32 %v1574_v54, 0.0 }
 0x1c9   :  { %v458_v62 = vmax.f32 %v390_v55, 0.0  ;;  %v837_v63 = vmax.f32 %v769_v56, 0.0 }
 0x1ca   :  { %v1692_v6 = vmax.f32 %v1264_v58, %v1643_v59 }
 0x1cb   :  { %v886_v9 = vmax.f32 %v458_v62, %v837_v63 }
 0x1cc   :  { %v1741_v11 = vmax.f32 %v885_v5, %v1692_v6 }
 0x1cd   :  { %v1196_v60 = vpop.f32.mrf.mxu2  ;;  %v1575_v61 = vpop.f32.mrf.mxu3 }
 0x1ce   :  { %v1197_v1 = vadd.f32 %v2995_v0, %v1196_v60  ;;  %v1576_v2 = vadd.f32 %v2995_v0, %v1575_v61  ;;  %v392_v3 = vpop.f32.mrf.mxu0  ;;  %v771_v4 = vpop.f32.mrf.mxu1 }
 0x1cf   :  { %v393_v18 = vadd.f32 %v2995_v0, %v392_v3  ;;  %v772_v19 = vadd.f32 %v2995_v0, %v771_v4 }
 0x1d0   :  { %v1265_v7 = vmax.f32 %v1197_v1, 0.0  ;;  %v1644_v8 = vmax.f32 %v1576_v2, 0.0 }
 0x1d1   :  { %v459_v24 = vmax.f32 %v393_v18, 0.0  ;;  %v838_v25 = vmax.f32 %v772_v19, 0.0 }
 0x1d2   :  { %v1693_v10 = vmax.f32 %v1265_v7, %v1644_v8 }
 0x1d3   :  { %v887_v36 = vmax.f32 %v459_v24, %v838_v25 }
 0x1d4   :  { %v1742_v12 = vmax.f32 %v886_v9, %v1693_v10 }
 0x1d5   :  { %v1199_v13 = vpop.f32.mrf.mxu2  ;;  %v1578_v14 = vpop.f32.mrf.mxu3 }
 0x1d6   :  { %v2469_v15 = vpack.c.bf16 %v1742_v12, %v1741_v11  ;;  %v394_v16 = vpop.f32.mrf.mxu0  ;;  %v773_v17 = vpop.f32.mrf.mxu1  ;;  %v1200_v20 = vadd.f32 %v2995_v0, %v1199_v13  ;;  %v1579_v21 = vadd.f32 %v2995_v0, %v1578_v14 }
 0x1d7   :  { %v395_v22 = vadd.f32 %v2995_v0, %v394_v16  ;;  %v774_v23 = vadd.f32 %v2995_v0, %v773_v17 }
 0x1d8   :  { %2513 = vst [vmem:[%s3167_s6 + $0x90] sm:$0xff] %v2469_v15   ;;  %v1266_v26 = vmax.f32 %v1200_v20, 0.0  ;;  %v1645_v27 = vmax.f32 %v1579_v21, 0.0 }
 0x1d9   :  { %v460_v30 = vmax.f32 %v395_v22, 0.0  ;;  %v839_v31 = vmax.f32 %v774_v23, 0.0 }
 0x1da   :  { %v1694_v37 = vmax.f32 %v1266_v26, %v1645_v27 }
 0x1db   :  { %v888_v40 = vmax.f32 %v460_v30, %v839_v31 }
 0x1dc   :  { %v1743_v42 = vmax.f32 %v887_v36, %v1694_v37 }
 0x1dd   :  { %v1201_v28 = vpop.f32.mrf.mxu2  ;;  %v1580_v29 = vpop.f32.mrf.mxu3 }
 0x1de   :  { %v1202_v32 = vadd.f32 %v2995_v0, %v1201_v28  ;;  %v1581_v33 = vadd.f32 %v2995_v0, %v1580_v29  ;;  %v397_v34 = vpop.f32.mrf.mxu0  ;;  %v776_v35 = vpop.f32.mrf.mxu1 }
 0x1df   :  { %v398_v50 = vadd.f32 %v2995_v0, %v397_v34  ;;  %v777_v51 = vadd.f32 %v2995_v0, %v776_v35 }
 0x1e0   :  { %v1267_v38 = vmax.f32 %v1202_v32, 0.0  ;;  %v1646_v39 = vmax.f32 %v1581_v33, 0.0 }
 0x1e1   :  { %v461_v56 = vmax.f32 %v398_v50, 0.0  ;;  %v840_v57 = vmax.f32 %v777_v51, 0.0 }
 0x1e2   :  { %v1695_v41 = vmax.f32 %v1267_v38, %v1646_v39 }
 0x1e3   :  { %v889_v4 = vmax.f32 %v461_v56, %v840_v57 }
 0x1e4   :  { %v1744_v43 = vmax.f32 %v888_v40, %v1695_v41 }
 0x1e5   :  { %v1204_v44 = vpop.f32.mrf.mxu2  ;;  %v1583_v45 = vpop.f32.mrf.mxu3 }
 0x1e6   :  { %v2474_v47 = vpack.c.bf16 %v1744_v43, %v1743_v42  ;;  %v399_v48 = vpop.f32.mrf.mxu0  ;;  %v778_v49 = vpop.f32.mrf.mxu1  ;;  %v1205_v52 = vadd.f32 %v2995_v0, %v1204_v44  ;;  %v1584_v53 = vadd.f32 %v2995_v0, %v1583_v45 }
 0x1e7   :  { %v400_v54 = vadd.f32 %v2995_v0, %v399_v48  ;;  %v779_v55 = vadd.f32 %v2995_v0, %v778_v49 }
 0x1e8   :  { %2514 = vst [vmem:[%s3167_s6 + $0x98] sm:$0xff] %v2474_v47   ;;  %v1268_v46 = vmax.f32 %v1205_v52, 0.0  ;;  %v1647_v58 = vmax.f32 %v1584_v53, 0.0 }
 0x1e9   :  { %v462_v61 = vmax.f32 %v400_v54, 0.0  ;;  %v841_v62 = vmax.f32 %v779_v55, 0.0 }
 0x1ea   :  { %v1696_v5 = vmax.f32 %v1268_v46, %v1647_v58 }
 0x1eb   :  { %v890_v8 = vmax.f32 %v462_v61, %v841_v62 }
 0x1ec   :  { %v1745_v10 = vmax.f32 %v889_v4, %v1696_v5 }
 0x1ed   :  { %v1206_v59 = vpop.f32.mrf.mxu2  ;;  %v1585_v60 = vpop.f32.mrf.mxu3 }
 0x1ee   :  { %v1207_v63 = vadd.f32 %v2995_v0, %v1206_v59  ;;  %v1586_v1 = vadd.f32 %v2995_v0, %v1585_v60  ;;  %v402_v2 = vpop.f32.mrf.mxu0  ;;  %v781_v3 = vpop.f32.mrf.mxu1 }
 0x1ef   :  { %v403_v17 = vadd.f32 %v2995_v0, %v402_v2  ;;  %v782_v18 = vadd.f32 %v2995_v0, %v781_v3 }
 0x1f0   :  { %v1269_v6 = vmax.f32 %v1207_v63, 0.0  ;;  %v1648_v7 = vmax.f32 %v1586_v1, 0.0 }
 0x1f1   :  { %v463_v23 = vmax.f32 %v403_v17, 0.0  ;;  %v842_v24 = vmax.f32 %v782_v18, 0.0 }
 0x1f2   :  { %v1697_v9 = vmax.f32 %v1269_v6, %v1648_v7 }
 0x1f3   :  { %v891_v35 = vmax.f32 %v463_v23, %v842_v24 }
 0x1f4   :  { %v1746_v11 = vmax.f32 %v890_v8, %v1697_v9 }
 0x1f5   :  { %v1209_v12 = vpop.f32.mrf.mxu2  ;;  %v1588_v13 = vpop.f32.mrf.mxu3 }
 0x1f6   :  { %v2479_v14 = vpack.c.bf16 %v1746_v11, %v1745_v10  ;;  %v404_v15 = vpop.f32.mrf.mxu0  ;;  %v783_v16 = vpop.f32.mrf.mxu1  ;;  %v1210_v19 = vadd.f32 %v2995_v0, %v1209_v12  ;;  %v1589_v20 = vadd.f32 %v2995_v0, %v1588_v13 }
 0x1f7   :  { %v405_v21 = vadd.f32 %v2995_v0, %v404_v15  ;;  %v784_v22 = vadd.f32 %v2995_v0, %v783_v16 }
 0x1f8   :  { %2515 = vst [vmem:[%s3167_s6 + $0xa0] sm:$0xff] %v2479_v14   ;;  %v1270_v25 = vmax.f32 %v1210_v19, 0.0  ;;  %v1649_v26 = vmax.f32 %v1589_v20, 0.0 }
 0x1f9   :  { %v464_v29 = vmax.f32 %v405_v21, 0.0  ;;  %v843_v30 = vmax.f32 %v784_v22, 0.0 }
 0x1fa   :  { %v1698_v36 = vmax.f32 %v1270_v25, %v1649_v26 }
 0x1fb   :  { %v892_v39 = vmax.f32 %v464_v29, %v843_v30 }
 0x1fc   :  { %v1747_v41 = vmax.f32 %v891_v35, %v1698_v36 }
 0x1fd   :  { %v1211_v27 = vpop.f32.mrf.mxu2  ;;  %v1590_v28 = vpop.f32.mrf.mxu3 }
 0x1fe   :  { %v1212_v31 = vadd.f32 %v2995_v0, %v1211_v27  ;;  %v1591_v32 = vadd.f32 %v2995_v0, %v1590_v28  ;;  %v407_v33 = vpop.f32.mrf.mxu0  ;;  %v786_v34 = vpop.f32.mrf.mxu1 }
 0x1ff   :  { %v408_v49 = vadd.f32 %v2995_v0, %v407_v33  ;;  %v787_v50 = vadd.f32 %v2995_v0, %v786_v34 }
 0x200   :  { %v1271_v37 = vmax.f32 %v1212_v31, 0.0  ;;  %v1650_v38 = vmax.f32 %v1591_v32, 0.0 }
 0x201   :  { %v465_v55 = vmax.f32 %v408_v49, 0.0  ;;  %v844_v56 = vmax.f32 %v787_v50, 0.0 }
 0x202   :  { %v1699_v40 = vmax.f32 %v1271_v37, %v1650_v38 }
 0x203   :  { %v893_v3 = vmax.f32 %v465_v55, %v844_v56 }
 0x204   :  { %v1748_v42 = vmax.f32 %v892_v39, %v1699_v40 }
 0x205   :  { %v1214_v43 = vpop.f32.mrf.mxu2  ;;  %v1593_v44 = vpop.f32.mrf.mxu3 }
 0x206   :  { %v2484_v45 = vpack.c.bf16 %v1748_v42, %v1747_v41  ;;  %v409_v47 = vpop.f32.mrf.mxu0  ;;  %v788_v48 = vpop.f32.mrf.mxu1  ;;  %v1215_v51 = vadd.f32 %v2995_v0, %v1214_v43  ;;  %v1594_v52 = vadd.f32 %v2995_v0, %v1593_v44 }
 0x207   :  { %v410_v53 = vadd.f32 %v2995_v0, %v409_v47  ;;  %v789_v54 = vadd.f32 %v2995_v0, %v788_v48 }
 0x208   :  { %2516 = vst [vmem:[%s3167_s6 + $0xa8] sm:$0xff] %v2484_v45   ;;  %v1272_v57 = vmax.f32 %v1215_v51, 0.0  ;;  %v1651_v46 = vmax.f32 %v1594_v52, 0.0 }
 0x209   :  { %v466_v60 = vmax.f32 %v410_v53, 0.0  ;;  %v845_v61 = vmax.f32 %v789_v54, 0.0 }
 0x20a   :  { %v1700_v4 = vmax.f32 %v1272_v57, %v1651_v46 }
 0x20b   :  { %v894_v7 = vmax.f32 %v466_v60, %v845_v61 }
 0x20c   :  { %v1749_v9 = vmax.f32 %v893_v3, %v1700_v4 }
 0x20d   :  { %v1216_v58 = vpop.f32.mrf.mxu2  ;;  %v1595_v59 = vpop.f32.mrf.mxu3 }
 0x20e   :  { %v1217_v62 = vadd.f32 %v2995_v0, %v1216_v58  ;;  %v1596_v63 = vadd.f32 %v2995_v0, %v1595_v59  ;;  %v412_v1 = vpop.f32.mrf.mxu0  ;;  %v791_v2 = vpop.f32.mrf.mxu1 }
 0x20f   :  { %v413_v16 = vadd.f32 %v2995_v0, %v412_v1  ;;  %v792_v17 = vadd.f32 %v2995_v0, %v791_v2 }
 0x210   :  { %v1273_v5 = vmax.f32 %v1217_v62, 0.0  ;;  %v1652_v6 = vmax.f32 %v1596_v63, 0.0 }
 0x211   :  { %v467_v22 = vmax.f32 %v413_v16, 0.0  ;;  %v846_v23 = vmax.f32 %v792_v17, 0.0 }
 0x212   :  { %v1701_v8 = vmax.f32 %v1273_v5, %v1652_v6 }
 0x213   :  { %v895_v34 = vmax.f32 %v467_v22, %v846_v23 }
 0x214   :  { %v1750_v10 = vmax.f32 %v894_v7, %v1701_v8 }
 0x215   :  { %v1219_v11 = vpop.f32.mrf.mxu2  ;;  %v1598_v12 = vpop.f32.mrf.mxu3 }
 0x216   :  { %v2489_v13 = vpack.c.bf16 %v1750_v10, %v1749_v9  ;;  %v414_v14 = vpop.f32.mrf.mxu0  ;;  %v793_v15 = vpop.f32.mrf.mxu1  ;;  %v1220_v18 = vadd.f32 %v2995_v0, %v1219_v11  ;;  %v1599_v19 = vadd.f32 %v2995_v0, %v1598_v12 }
 0x217   :  { %v415_v20 = vadd.f32 %v2995_v0, %v414_v14  ;;  %v794_v21 = vadd.f32 %v2995_v0, %v793_v15 }
 0x218   :  { %2517 = vst [vmem:[%s3167_s6 + $0xb0] sm:$0xff] %v2489_v13   ;;  %v1274_v24 = vmax.f32 %v1220_v18, 0.0  ;;  %v1653_v25 = vmax.f32 %v1599_v19, 0.0 }
 0x219   :  { %v468_v28 = vmax.f32 %v415_v20, 0.0  ;;  %v847_v29 = vmax.f32 %v794_v21, 0.0 }
 0x21a   :  { %v1702_v35 = vmax.f32 %v1274_v24, %v1653_v25 }
 0x21b   :  { %v896_v40 = vmax.f32 %v468_v28, %v847_v29 }
 0x21c   :  { %v1751_v42 = vmax.f32 %v895_v34, %v1702_v35 }
 0x21d   :  { %v1221_v26 = vpop.f32.mrf.mxu2  ;;  %v1600_v27 = vpop.f32.mrf.mxu3 }
 0x21e   :  { %v1222_v30 = vadd.f32 %v2995_v0, %v1221_v26  ;;  %v1601_v31 = vadd.f32 %v2995_v0, %v1600_v27  ;;  %v417_v32 = vpop.f32.mrf.mxu0  ;;  %v796_v33 = vpop.f32.mrf.mxu1 }
 0x21f   :  { %v418_v38 = vadd.f32 %v2995_v0, %v417_v32  ;;  %v797_v39 = vadd.f32 %v2995_v0, %v796_v33 }
 0x220   :  { %v1275_v36 = vmax.f32 %v1222_v30, 0.0  ;;  %v1654_v37 = vmax.f32 %v1601_v31, 0.0 }
 0x221   :  { %v469_v44 = vmax.f32 %v418_v38, 0.0  ;;  %v848_v45 = vmax.f32 %v797_v39, 0.0 }
 0x222   :  { %v1703_v41 = vmax.f32 %v1275_v36, %v1654_v37 }
 0x223   :  { %v897_v54 = vmax.f32 %v469_v44, %v848_v45 }
 0x224   :  { %v1752_v43 = vmax.f32 %v896_v40, %v1703_v41 }
 0x225   :  { %v1224_v47 = vpop.f32.mrf.mxu2  ;;  %v1603_v48 = vpop.f32.mrf.mxu3 }
 0x226   :  { %v2494_v49 = vpack.c.bf16 %v1752_v43, %v1751_v42  ;;  %v1225_v50 = vadd.f32 %v2995_v0, %v1224_v47  ;;  %v1604_v51 = vadd.f32 %v2995_v0, %v1603_v48  ;;  %v419_v52 = vpop.f32.mrf.mxu0  ;;  %v798_v53 = vpop.f32.mrf.mxu1 }
 0x228   :  { %2518 = vst [vmem:[%s3167_s6 + $0xb8] sm:$0xff] %v2494_v49   ;;  %v1276_v55 = vmax.f32 %v1225_v50, 0.0  ;;  %v1655_v56 = vmax.f32 %v1604_v51, 0.0 }
 0x22a   :  { %v1704_v57 = vmax.f32 %v1276_v55, %v1655_v56 }
 0x22c   :  { %v1753_v46 = vmax.f32 %v897_v54, %v1704_v57 }
 0x22d   :  { %v1226_v58 = vpop.f32.mrf.mxu2  ;;  %v1605_v59 = vpop.f32.mrf.mxu3 }
 0x22e   :  { %v1802_v60 = vpack.c.bf16 %v1753_v46, %v1753_v46 }
 0x230   :  { %1851 = vst [vmem:[%s3167_s6 + $0xc0] sm:$0xf] %v1802_v60 }

// kernel: lenet_forward.4
= control target key start
LH: loop header
LB: loop body
LE: loop exit
PB: predicated region body
PF: predicated region fallthrough
CT: control target
= control target key end

     0   :  { %s1241_s4 = inlined_call_operand.vmem [shape: bf16[256,128], index: 4, kind: input, shape index: {}]   ;;  %s1242_s5 = inlined_call_operand.vmem [shape: f32[1,128], index: 5, kind: input, shape index: {}]   ;;  %s1243_s0 = inlined_call_operand.vmem [shape: bf16[56,256], index: 0, kind: input, shape index: {}]   ;;  %s1244_s1 = inlined_call_operand.vmem [shape: bf16[56,256], index: 1, kind: input, shape index: {}]   ;;  %s1245_s2 = inlined_call_operand.vmem [shape: bf16[56,256], index: 2, kind: input, shape index: {}]   ;;  %s1246_s3 = inlined_call_operand.vmem [shape: bf16[56,256], index: 3, kind: input, shape index: {}]   ;;  %s1247_s6 = inlined_call_operand.vmem [shape: bf16[56,128], index: 6, kind: output, shape index: {}]  }
   0x1   :  { %v878_v0 = vld [vmem:[%s1241_s4 + $0x38] sm:$0xff]  ;;  %v890_v2 = vld [vmem:[%s1241_s4 + $0x30] sm:$0xff]  ;;  %v904_v4 = vld [vmem:[%s1241_s4 + $0x28] sm:$0xff] }
   0x2   :  { %v883_v1 = vld [vmem:[%s1241_s4 + $0x78] sm:$0xff]  ;;  %199 = vmatpush.bf16.msra.mxu0 %v878_v0  ;;  %v895_v3 = vld [vmem:[%s1241_s4 + $0x70] sm:$0xff]  ;;  %306 = vmatpush.bf16.msra.mxu2 %v878_v0  ;;  %v909_v5 = vld [vmem:[%s1241_s4 + $0x68] sm:$0xff] }
   0x3   :  { %227 = vmatpush.bf16.msra.mxu1 %v883_v1  ;;  %334 = vmatpush.bf16.msra.mxu3 %v883_v1  ;;  %v918_v6 = vld [vmem:[%s1241_s4 + $0x20] sm:$0xff]  ;;  %v932_v8 = vld [vmem:[%s1241_s4 + $0x18] sm:$0xff]  ;;  %v946_v10 = vld [vmem:[%s1241_s4 + $0x10] sm:$0xff] }
   0x4   :  { %v923_v7 = vld [vmem:[%s1241_s4 + $0x60] sm:$0xff]  ;;  %v937_v9 = vld [vmem:[%s1241_s4 + $0x58] sm:$0xff]  ;;  %v951_v11 = vld [vmem:[%s1241_s4 + $0x50] sm:$0xff] }
   0x5   :  { %v960_v12 = vld [vmem:[%s1241_s4 + $0x8] sm:$0xff]  ;;  %v972_v14 = vld [vmem:[%s1241_s4] sm:$0xff]  ;;  %v632_v28 = vld [vmem:[%s1243_s0 + $0x10] sm:$0xf] }
   0x6   :  { %200 = vmatpush.bf16.msra.mxu0 %v890_v2  ;;  %307 = vmatpush.bf16.msra.mxu2 %v890_v2  ;;  %v965_v13 = vld [vmem:[%s1241_s4 + $0x48] sm:$0xff]  ;;  %v977_v15 = vld [vmem:[%s1241_s4 + $0x40] sm:$0xff]  ;;  %v801_v29 = vld [vmem:[%s1243_s0 + $0x14] sm:$0xf0] }
   0x7   :  { %228 = vmatpush.bf16.msra.mxu1 %v895_v3  ;;  %335 = vmatpush.bf16.msra.mxu3 %v895_v3  ;;  %v624_v16 = vld [vmem:[%s1243_s0] sm:$0xf]  ;;  %v799_v17 = vld [vmem:[%s1243_s0 + $0x4] sm:$0xf0]  ;;  %v798_v18 = vld [vmem:[%s1243_s0 + $0x4] sm:$0xf]  ;;  %v633_v36 = vor.u32 %v801_v29, %v632_v28 }
   0x8   :  { %v626_v19 = vld [vmem:[%s1243_s0 + $0x8] sm:$0xf0]  ;;  %v712_v20 = vld [vmem:[%s1244_s1] sm:$0xf]  ;;  %v805_v21 = vld [vmem:[%s1244_s1 + $0x4] sm:$0xf0]  ;;  %v625_v24 = vor.u32 %v799_v17, %v624_v16 }
   0x9   :  { %v804_v22 = vld [vmem:[%s1244_s1 + $0x4] sm:$0xf]  ;;  %v714_v23 = vld [vmem:[%s1244_s1 + $0x8] sm:$0xf0]  ;;  %v629_v25 = vor.u32 %v798_v18, %v626_v19  ;;  %v713_v26 = vor.u32 %v805_v21, %v712_v20  ;;  %v800_v30 = vld [vmem:[%s1243_s0 + $0x14] sm:$0xf] }
   0xa   :  { %201 = vmatpush.bf16.msra.mxu0 %v904_v4  ;;  %308 = vmatpush.bf16.msra.mxu2 %v904_v4  ;;  %v717_v27 = vor.u32 %v804_v22, %v714_v23  ;;  %v634_v31 = vld [vmem:[%s1243_s0 + $0x18] sm:$0xf0]  ;;  %v720_v32 = vld [vmem:[%s1244_s1 + $0x10] sm:$0xf]  ;;  %v807_v33 = vld [vmem:[%s1244_s1 + $0x14] sm:$0xf0] }
   0xb   :  { %229 = vmatpush.bf16.msra.mxu1 %v909_v5  ;;  %336 = vmatpush.bf16.msra.mxu3 %v909_v5  ;;  %v806_v34 = vld [vmem:[%s1244_s1 + $0x14] sm:$0xf]  ;;  %v722_v35 = vld [vmem:[%s1244_s1 + $0x18] sm:$0xf0]  ;;  %v637_v37 = vor.u32 %v800_v30, %v634_v31  ;;  %v721_v38 = vor.u32 %v807_v33, %v720_v32  ;;  %v640_v40 = vld [vmem:[%s1243_s0 + $0x20] sm:$0xf] }
   0xc   :  { %v725_v39 = vor.u32 %v806_v34, %v722_v35  ;;  %v803_v41 = vld [vmem:[%s1243_s0 + $0x24] sm:$0xf0]  ;;  %v802_v42 = vld [vmem:[%s1243_s0 + $0x24] sm:$0xf]  ;;  %v642_v43 = vld [vmem:[%s1243_s0 + $0x28] sm:$0xf0] }
   0xd   :  { %v728_v44 = vld [vmem:[%s1244_s1 + $0x20] sm:$0xf]  ;;  %v809_v45 = vld [vmem:[%s1244_s1 + $0x24] sm:$0xf0]  ;;  %v808_v46 = vld [vmem:[%s1244_s1 + $0x24] sm:$0xf]  ;;  %v641_v48 = vor.u32 %v803_v41, %v640_v40  ;;  %v645_v49 = vor.u32 %v802_v42, %v642_v43 }
   0xe   :  { %202 = vmatpush.bf16.msra.mxu0 %v918_v6  ;;  %309 = vmatpush.bf16.msra.mxu2 %v918_v6  ;;  %v730_v47 = vld [vmem:[%s1244_s1 + $0x28] sm:$0xf0]  ;;  %v729_v50 = vor.u32 %v809_v45, %v728_v44  ;;  %v62_v52 = vld [vmem:[%s1243_s0 + $0x30] sm:$0xff]  ;;  %v736_v62 = vld [vmem:[%s1245_s2] sm:$0xf] }
   0xf   :  { %230 = vmatpush.bf16.msra.mxu1 %v923_v7  ;;  %337 = vmatpush.bf16.msra.mxu3 %v923_v7  ;;  %v733_v51 = vor.u32 %v808_v46, %v730_v47  ;;  %v268_v53 = vld [vmem:[%s1244_s1 + $0x30] sm:$0xff]  ;;  %v85_v54 = vunpack.c.l.b16 %v62_v52  ;;  %v86_v55 = vunpack.c.h.b16 %v62_v52  ;;  %v811_v63 = vld [vmem:[%s1245_s2 + $0x4] sm:$0xf0]  ;;  %v770_v17 = vld [vmem:[%s1246_s3 + $0x18] sm:$0xf0] }
  0x10   :  { %v288_v56 = vunpack.c.l.b16 %v268_v53  ;;  %v289_v57 = vunpack.c.h.b16 %v268_v53  ;;  %v818_v16 = vld [vmem:[%s1246_s3 + $0x14] sm:$0xf]  ;;  %v752_v22 = vld [vmem:[%s1245_s2 + $0x20] sm:$0xf]  ;;  %v815_v23 = vld [vmem:[%s1245_s2 + $0x24] sm:$0xf0] }
  0x11   :  { %v93_v58 = vpack.c.b16 %v85_v54, %v85_v54  ;;  %v94_v59 = vpack.c.b16 %v86_v55, %v86_v55  ;;  %v773_v21 = vor.u32 %v818_v16, %v770_v17  ;;  %v820_v28 = vld [vmem:[%s1246_s3 + $0x24] sm:$0xf]  ;;  %v778_v29 = vld [vmem:[%s1246_s3 + $0x28] sm:$0xf0]  ;;  %v753_v30 = vor.u32 %v815_v23, %v752_v22  ;;  %v382_v34 = vld [vmem:[%s1245_s2 + $0x30] sm:$0xff] }
  0x12   :  { %203 = vmatpush.bf16.msra.mxu0 %v932_v8  ;;  %310 = vmatpush.bf16.msra.mxu2 %v932_v8  ;;  %v296_v60 = vpack.c.b16 %v288_v56, %v288_v56  ;;  %v297_v61 = vpack.c.b16 %v289_v57, %v289_v57  ;;  %v781_v33 = vor.u32 %v820_v28, %v778_v29  ;;  %v489_v35 = vld [vmem:[%s1246_s3 + $0x30] sm:$0xff]  ;;  %v1178_v44 = vld [vmem:[%s1242_s5] ss:$0 sm:$0xff] }
  0x13   :  { %231 = vmatpush.bf16.msra.mxu1 %v937_v9  ;;  %338 = vmatpush.bf16.msra.mxu3 %v937_v9 }
  0x16   :  { %204 = vmatpush.bf16.msra.mxu0 %v946_v10  ;;  %311 = vmatpush.bf16.msra.mxu2 %v946_v10 }
  0x17   :  { %232 = vmatpush.bf16.msra.mxu1 %v951_v11  ;;  %339 = vmatpush.bf16.msra.mxu3 %v951_v11 }
  0x1a   :  { %205 = vmatpush.bf16.msra.mxu0 %v960_v12  ;;  %312 = vmatpush.bf16.msra.mxu2 %v960_v12 }
  0x1b   :  { %233 = vmatpush.bf16.msra.mxu1 %v965_v13  ;;  %340 = vmatpush.bf16.msra.mxu3 %v965_v13 }
  0x1e   :  { %206 = vmatpush.bf16.msra.mxu0 %v972_v14  ;;  %313 = vmatpush.bf16.msra.mxu2 %v972_v14 }
  0x1f   :  { %234 = vmatpush.bf16.msra.mxu1 %v977_v15  ;;  %341 = vmatpush.bf16.msra.mxu3 %v977_v15 }
  0x21   :  { %207 = vmatmul.bf16.vlgmr.msra.gmra.mxu0 %v625_v24  ;;  %314 = vmatmul.bf16.vlgmr.msra.gmra.mxu2 %v713_v26  ;;  %v814_v24 = vld [vmem:[%s1245_s2 + $0x24] sm:$0xf]  ;;  %v776_v26 = vld [vmem:[%s1246_s3 + $0x20] sm:$0xf] }
  0x22   :  { %527 = vmatpush.bf16.msrb.mxu2 %v878_v0  ;;  %235 = vmatmul.bf16.vlgmr.msra.gmra.mxu1 %v629_v25  ;;  %v754_v25 = vld [vmem:[%s1245_s2 + $0x28] sm:$0xf0] }
  0x23   :  { %555 = vmatpush.bf16.msrb.mxu3 %v883_v1  ;;  %420 = vmatpush.bf16.msrb.mxu0 %v878_v0  ;;  %v810_v0 = vld [vmem:[%s1245_s2 + $0x4] sm:$0xf]  ;;  %v757_v31 = vor.u32 %v814_v24, %v754_v25 }
  0x24   :  { %342 = vmatmul.bf16.vlgmr.msra.gmra.mxu3 %v717_v27  ;;  %448 = vmatpush.bf16.msrb.mxu1 %v883_v1  ;;  %v738_v1 = vld [vmem:[%s1245_s2 + $0x8] sm:$0xf0]  ;;  %v821_v27 = vld [vmem:[%s1246_s3 + $0x24] sm:$0xf0] }
  0x25   :  { %v777_v32 = vor.u32 %v821_v27, %v776_v26 }
  0x26   :  { %528 = vmatpush.bf16.msrb.mxu2 %v890_v2 }
  0x27   :  { %556 = vmatpush.bf16.msrb.mxu3 %v895_v3  ;;  %421 = vmatpush.bf16.msrb.mxu0 %v890_v2  ;;  %v760_v2 = vld [vmem:[%s1246_s3] sm:$0xf] }
  0x28   :  { %449 = vmatpush.bf16.msrb.mxu1 %v895_v3  ;;  %v817_v3 = vld [vmem:[%s1246_s3 + $0x4] sm:$0xf0] }
  0x2a   :  { %529 = vmatpush.bf16.msrb.mxu2 %v904_v4 }
  0x2b   :  { %557 = vmatpush.bf16.msrb.mxu3 %v909_v5  ;;  %422 = vmatpush.bf16.msrb.mxu0 %v904_v4  ;;  %v816_v4 = vld [vmem:[%s1246_s3 + $0x4] sm:$0xf] }
  0x2c   :  { %450 = vmatpush.bf16.msrb.mxu1 %v909_v5  ;;  %v762_v5 = vld [vmem:[%s1246_s3 + $0x8] sm:$0xf0] }
  0x2e   :  { %530 = vmatpush.bf16.msrb.mxu2 %v918_v6 }
  0x2f   :  { %558 = vmatpush.bf16.msrb.mxu3 %v923_v7  ;;  %423 = vmatpush.bf16.msrb.mxu0 %v918_v6  ;;  %v737_v6 = vor.u32 %v811_v63, %v736_v62 }
  0x30   :  { %451 = vmatpush.bf16.msrb.mxu1 %v923_v7  ;;  %v741_v7 = vor.u32 %v810_v0, %v738_v1 }
  0x31   :  { %212 = vmatmul.bf16.gmra.mxu0 %v633_v36  ;;  %319 = vmatmul.bf16.gmra.mxu2 %v721_v38  ;;  %v402_v36 = vunpack.c.l.b16 %v382_v34  ;;  %v509_v38 = vunpack.c.l.b16 %v489_v35 }
  0x32   :  { %531 = vmatpush.bf16.msrb.mxu2 %v932_v8  ;;  %240 = vmatmul.bf16.gmra.mxu1 %v637_v37  ;;  %v403_v37 = vunpack.c.h.b16 %v382_v34 }
  0x33   :  { %559 = vmatpush.bf16.msrb.mxu3 %v937_v9  ;;  %424 = vmatpush.bf16.msrb.mxu0 %v932_v8  ;;  %v761_v8 = vor.u32 %v817_v3, %v760_v2  ;;  %v410_v40 = vpack.c.b16 %v402_v36, %v402_v36  ;;  %v517_v42 = vpack.c.b16 %v509_v38, %v509_v38 }
  0x34   :  { %347 = vmatmul.bf16.gmra.mxu3 %v725_v39  ;;  %452 = vmatpush.bf16.msrb.mxu1 %v937_v9  ;;  %v765_v9 = vor.u32 %v816_v4, %v762_v5  ;;  %v510_v39 = vunpack.c.h.b16 %v489_v35  ;;  %v411_v41 = vpack.c.b16 %v403_v37, %v403_v37 }
  0x36   :  { %532 = vmatpush.bf16.msrb.mxu2 %v946_v10  ;;  %v518_v43 = vpack.c.b16 %v510_v39, %v510_v39 }
  0x37   :  { %560 = vmatpush.bf16.msrb.mxu3 %v951_v11  ;;  %425 = vmatpush.bf16.msrb.mxu0 %v946_v10  ;;  %v744_v10 = vld [vmem:[%s1245_s2 + $0x10] sm:$0xf] }
  0x38   :  { %453 = vmatpush.bf16.msrb.mxu1 %v951_v11  ;;  %v813_v11 = vld [vmem:[%s1245_s2 + $0x14] sm:$0xf0] }
  0x39   :  { %v745_v18 = vor.u32 %v813_v11, %v744_v10 }
  0x3a   :  { %533 = vmatpush.bf16.msrb.mxu2 %v960_v12 }
  0x3b   :  { %561 = vmatpush.bf16.msrb.mxu3 %v965_v13  ;;  %426 = vmatpush.bf16.msrb.mxu0 %v960_v12  ;;  %v812_v12 = vld [vmem:[%s1245_s2 + $0x14] sm:$0xf] }
  0x3c   :  { %454 = vmatpush.bf16.msrb.mxu1 %v965_v13  ;;  %v746_v13 = vld [vmem:[%s1245_s2 + $0x18] sm:$0xf0] }
  0x3d   :  { %v749_v19 = vor.u32 %v812_v12, %v746_v13 }
  0x3e   :  { %534 = vmatpush.bf16.msrb.mxu2 %v972_v14 }
  0x3f   :  { %562 = vmatpush.bf16.msrb.mxu3 %v977_v15  ;;  %427 = vmatpush.bf16.msrb.mxu0 %v972_v14  ;;  %v768_v14 = vld [vmem:[%s1246_s3 + $0x10] sm:$0xf] }
  0x40   :  { %455 = vmatpush.bf16.msrb.mxu1 %v977_v15  ;;  %v819_v15 = vld [vmem:[%s1246_s3 + $0x14] sm:$0xf0] }
  0x41   :  { %217 = vmatmul.bf16.gmra.mxu0 %v641_v48  ;;  %324 = vmatmul.bf16.gmra.mxu2 %v729_v50  ;;  %v769_v20 = vor.u32 %v819_v15, %v768_v14 }
  0x42   :  { %245 = vmatmul.bf16.gmra.mxu1 %v645_v49 }
  0x44   :  { %352 = vmatmul.bf16.gmra.mxu3 %v733_v51 }
  0x51   :  { %222 = vmatmul.bf16.gmra.mxu0 %v93_v58  ;;  %329 = vmatmul.bf16.gmra.mxu2 %v296_v60 }
  0x52   :  { %250 = vmatmul.bf16.gmra.mxu1 %v94_v59 }
  0x54   :  { %357 = vmatmul.bf16.gmra.mxu3 %v297_v61 }
  0x61   :  { %428 = vmatmul.bf16.vlgmr.msrb.gmra.mxu0 %v737_v6  ;;  %535 = vmatmul.bf16.vlgmr.msrb.gmra.mxu2 %v761_v8 }
  0x62   :  { %456 = vmatmul.bf16.vlgmr.msrb.gmra.mxu1 %v741_v7 }
  0x64   :  { %563 = vmatmul.bf16.vlgmr.msrb.gmra.mxu3 %v765_v9 }
  0x71   :  { %433 = vmatmul.bf16.gmra.mxu0 %v745_v18  ;;  %540 = vmatmul.bf16.gmra.mxu2 %v769_v20 }
  0x72   :  { %461 = vmatmul.bf16.gmra.mxu1 %v749_v19 }
  0x74   :  { %568 = vmatmul.bf16.gmra.mxu3 %v773_v21 }
  0x81   :  { %438 = vmatmul.bf16.gmra.mxu0 %v753_v30  ;;  %545 = vmatmul.bf16.gmra.mxu2 %v777_v32 }
  0x82   :  { %466 = vmatmul.bf16.gmra.mxu1 %v757_v31 }
  0x84   :  { %573 = vmatmul.bf16.gmra.mxu3 %v781_v33 }
  0x91   :  { %443 = vmatmul.bf16.gmra.mxu0 %v410_v40  ;;  %550 = vmatmul.bf16.gmra.mxu2 %v517_v42 }
  0x92   :  { %471 = vmatmul.bf16.gmra.mxu1 %v411_v41 }
  0x94   :  { %578 = vmatmul.bf16.gmra.mxu3 %v518_v43 }
  0x9e   :  { %v208_v45 = vpop.f32.mrf.mxu0 }
  0x9f   :  { %v236_v46 = vpop.f32.mrf.mxu1  ;;  %v209_v47 = vadd.f32 %v1178_v44, %v208_v45 }
  0xa1   :  { %v237_v48 = vadd.f32 %v236_v46, %v209_v47 }
  0xa3   :  { %v255_v55 = vmax.f32 %v237_v48, 0.0 }
  0xa4   :  { %v315_v49 = vpop.f32.mrf.mxu2 }
  0xa5   :  { %v316_v51 = vadd.f32 %v1178_v44, %v315_v49 }
  0xa6   :  { %v210_v52 = vpop.f32.mrf.mxu0 }
  0xa7   :  { %v343_v50 = vpop.f32.mrf.mxu3  ;;  %v238_v53 = vpop.f32.mrf.mxu1  ;;  %v211_v54 = vadd.f32 %v1178_v44, %v210_v52 }
  0xa8   :  { %v344_v56 = vadd.f32 %v343_v50, %v316_v51 }
  0xa9   :  { %v239_v57 = vadd.f32 %v238_v53, %v211_v54 }
  0xaa   :  { %v362_v58 = vmax.f32 %v344_v56, 0.0 }
  0xab   :  { %v256_v4 = vmax.f32 %v239_v57, 0.0 }
  0xac   :  { %v1183_v59 = vmax.f32 %v255_v55, %v362_v58  ;;  %v317_v60 = vpop.f32.mrf.mxu2 }
  0xad   :  { %v318_v62 = vadd.f32 %v1178_v44, %v317_v60 }
  0xae   :  { %v213_v63 = vpop.f32.mrf.mxu0 }
  0xaf   :  { %v345_v61 = vpop.f32.mrf.mxu3  ;;  %v241_v0 = vpop.f32.mrf.mxu1  ;;  %v214_v1 = vadd.f32 %v1178_v44, %v213_v63 }
  0xb0   :  { %v346_v2 = vadd.f32 %v345_v61, %v318_v62 }
  0xb1   :  { %v242_v3 = vadd.f32 %v241_v0, %v214_v1 }
  0xb2   :  { %v363_v5 = vmax.f32 %v346_v2, 0.0 }
  0xb3   :  { %v257_v13 = vmax.f32 %v242_v3, 0.0 }
  0xb4   :  { %v1187_v6 = vmax.f32 %v256_v4, %v363_v5  ;;  %v320_v7 = vpop.f32.mrf.mxu2 }
  0xb5   :  { %v321_v9 = vadd.f32 %v1178_v44, %v320_v7 }
  0xb6   :  { %v215_v10 = vpop.f32.mrf.mxu0 }
  0xb7   :  { %v348_v8 = vpop.f32.mrf.mxu3  ;;  %v243_v11 = vpop.f32.mrf.mxu1  ;;  %v216_v12 = vadd.f32 %v1178_v44, %v215_v10 }
  0xb8   :  { %v349_v14 = vadd.f32 %v348_v8, %v321_v9 }
  0xb9   :  { %v244_v15 = vadd.f32 %v243_v11, %v216_v12 }
  0xba   :  { %v364_v16 = vmax.f32 %v349_v14, 0.0 }
  0xbb   :  { %v258_v26 = vmax.f32 %v244_v15, 0.0 }
  0xbc   :  { %v1191_v17 = vmax.f32 %v257_v13, %v364_v16  ;;  %v322_v18 = vpop.f32.mrf.mxu2 }
  0xbd   :  { %v323_v20 = vadd.f32 %v1178_v44, %v322_v18 }
  0xbe   :  { %v218_v21 = vpop.f32.mrf.mxu0 }
  0xbf   :  { %v350_v19 = vpop.f32.mrf.mxu3  ;;  %v246_v22 = vpop.f32.mrf.mxu1  ;;  %v219_v23 = vadd.f32 %v1178_v44, %v218_v21 }
  0xc0   :  { %v351_v24 = vadd.f32 %v350_v19, %v323_v20 }
  0xc1   :  { %v247_v25 = vadd.f32 %v246_v22, %v219_v23 }
  0xc2   :  { %v365_v27 = vmax.f32 %v351_v24, 0.0 }
  0xc3   :  { %v259_v35 = vmax.f32 %v247_v25, 0.0 }
  0xc4   :  { %v1195_v28 = vmax.f32 %v258_v26, %v365_v27  ;;  %v325_v29 = vpop.f32.mrf.mxu2 }
  0xc5   :  { %v326_v31 = vadd.f32 %v1178_v44, %v325_v29 }
  0xc6   :  { %v220_v32 = vpop.f32.mrf.mxu0 }
  0xc7   :  { %v353_v30 = vpop.f32.mrf.mxu3  ;;  %v248_v33 = vpop.f32.mrf.mxu1  ;;  %v221_v34 = vadd.f32 %v1178_v44, %v220_v32 }
  0xc8   :  { %v354_v36 = vadd.f32 %v353_v30, %v326_v31 }
  0xc9   :  { %v249_v37 = vadd.f32 %v248_v33, %v221_v34 }
  0xca   :  { %v366_v38 = vmax.f32 %v354_v36, 0.0 }
  0xcb   :  { %v260_v49 = vmax.f32 %v249_v37, 0.0 }
  0xcc   :  { %v1199_v39 = vmax.f32 %v259_v35, %v366_v38  ;;  %v327_v40 = vpop.f32.mrf.mxu2 }
  0xcd   :  { %v328_v42 = vadd.f32 %v1178_v44, %v327_v40 }
  0xce   :  { %v223_v43 = vpop.f32.mrf.mxu0 }
  0xcf   :  { %v355_v41 = vpop.f32.mrf.mxu3  ;;  %v251_v45 = vpop.f32.mrf.mxu1  ;;  %v224_v46 = vadd.f32 %v1178_v44, %v223_v43 }
  0xd0   :  { %v356_v47 = vadd.f32 %v355_v41, %v328_v42 }
  0xd1   :  { %v252_v48 = vadd.f32 %v251_v45, %v224_v46 }
  0xd2   :  { %v367_v50 = vmax.f32 %v356_v47, 0.0 }
  0xd3   :  { %v261_v57 = vmax.f32 %v252_v48, 0.0 }
  0xd4   :  { %v1203_v51 = vmax.f32 %v260_v49, %v367_v50  ;;  %v330_v52 = vpop.f32.mrf.mxu2 }
  0xd5   :  { %v331_v54 = vadd.f32 %v1178_v44, %v330_v52 }
  0xd6   :  { %v225_v55 = vpop.f32.mrf.mxu0 }
  0xd7   :  { %v358_v53 = vpop.f32.mrf.mxu3  ;;  %v253_v56 = vpop.f32.mrf.mxu1 }
  0xd8   :  { %v359_v58 = vadd.f32 %v358_v53, %v331_v54 }
  0xda   :  { %v368_v60 = vmax.f32 %v359_v58, 0.0 }
  0xdc   :  { %v1206_v61 = vmax.f32 %v261_v57, %v368_v60  ;;  %v332_v62 = vpop.f32.mrf.mxu2 }
  0xde   :  { %v429_v0 = vpop.f32.mrf.mxu0 }
  0xdf   :  { %v360_v63 = vpop.f32.mrf.mxu3  ;;  %v457_v1 = vpop.f32.mrf.mxu1  ;;  %v430_v4 = vadd.f32 %v1178_v44, %v429_v0 }
  0xe1   :  { %v458_v9 = vadd.f32 %v457_v1, %v430_v4 }
  0xe3   :  { %v476_v14 = vmax.f32 %v458_v9, 0.0 }
  0xe4   :  { %v536_v2 = vpop.f32.mrf.mxu2 }
  0xe5   :  { %v537_v5 = vadd.f32 %v1178_v44, %v536_v2 }
  0xe6   :  { %v431_v7 = vpop.f32.mrf.mxu0 }
  0xe7   :  { %v564_v3 = vpop.f32.mrf.mxu3  ;;  %v459_v8 = vpop.f32.mrf.mxu1  ;;  %v432_v11 = vadd.f32 %v1178_v44, %v431_v7 }
  0xe8   :  { %v565_v10 = vadd.f32 %v564_v3, %v537_v5 }
  0xe9   :  { %v460_v16 = vadd.f32 %v459_v8, %v432_v11 }
  0xea   :  { %v583_v15 = vmax.f32 %v565_v10, 0.0 }
  0xeb   :  { %v477_v23 = vmax.f32 %v460_v16, 0.0 }
  0xec   :  { %v538_v12 = vpop.f32.mrf.mxu2  ;;  %v590_v22 = vmax.f32 %v476_v14, %v583_v15 }
  0xed   :  { %v539_v18 = vadd.f32 %v1178_v44, %v538_v12 }
  0xee   :  { %v434_v19 = vpop.f32.mrf.mxu0  ;;  %v597_v29 = vmax.f32 %v1183_v59, %v590_v22 }
  0xef   :  { %v566_v13 = vpop.f32.mrf.mxu3  ;;  %v462_v20 = vpop.f32.mrf.mxu1  ;;  %v435_v31 = vadd.f32 %v1178_v44, %v434_v19 }
  0xf0   :  { %v567_v21 = vadd.f32 %v566_v13, %v539_v18 }
  0xf1   :  { %v463_v36 = vadd.f32 %v462_v20, %v435_v31 }
  0xf2   :  { %v584_v24 = vmax.f32 %v567_v21, 0.0 }
  0xf3   :  { %v478_v59 = vmax.f32 %v463_v36, 0.0 }
  0xf4   :  { %v591_v25 = vmax.f32 %v477_v23, %v584_v24  ;;  %v541_v26 = vpop.f32.mrf.mxu2 }
  0xf5   :  { %v542_v32 = vadd.f32 %v1178_v44, %v541_v26 }
  0xf6   :  { %v598_v30 = vmax.f32 %v1187_v6, %v591_v25  ;;  %v436_v33 = vpop.f32.mrf.mxu0 }
  0xf7   :  { %v569_v27 = vpop.f32.mrf.mxu3  ;;  %v464_v34 = vpop.f32.mrf.mxu1  ;;  %v437_v38 = vadd.f32 %v1178_v44, %v436_v33 }
  0xf8   :  { %v825_v35 = vpack.c.bf16 %v598_v30, %v597_v29  ;;  %v570_v37 = vadd.f32 %v569_v27, %v542_v32 }
  0xf9   :  { %v465_v6 = vadd.f32 %v464_v34, %v437_v38 }
  0xfa   :  { %826 = vst [vmem:[%s1247_s6] sm:$0xff] %v825_v35   ;;  %v585_v42 = vmax.f32 %v570_v37, 0.0 }
  0xfb   :  { %v479_v49 = vmax.f32 %v465_v6, 0.0 }
  0xfc   :  { %v543_v40 = vpop.f32.mrf.mxu2  ;;  %v592_v48 = vmax.f32 %v478_v59, %v585_v42 }
  0xfd   :  { %v544_v43 = vadd.f32 %v1178_v44, %v543_v40 }
  0xfe   :  { %v439_v45 = vpop.f32.mrf.mxu0  ;;  %v599_v55 = vmax.f32 %v1191_v17, %v592_v48 }
  0xff   :  { %v571_v41 = vpop.f32.mrf.mxu3  ;;  %v467_v46 = vpop.f32.mrf.mxu1  ;;  %v440_v57 = vadd.f32 %v1178_v44, %v439_v45 }
 0x100   :  { %v572_v47 = vadd.f32 %v571_v41, %v544_v43 }
 0x101   :  { %v468_v0 = vadd.f32 %v467_v46, %v440_v57 }
 0x102   :  { %v586_v50 = vmax.f32 %v572_v47, 0.0 }
 0x103   :  { %v480_v17 = vmax.f32 %v468_v0, 0.0 }
 0x104   :  { %v593_v52 = vmax.f32 %v479_v49, %v586_v50  ;;  %v546_v53 = vpop.f32.mrf.mxu2 }
 0x105   :  { %v547_v58 = vadd.f32 %v1178_v44, %v546_v53 }
 0x106   :  { %v600_v56 = vmax.f32 %v1195_v28, %v593_v52  ;;  %v441_v60 = vpop.f32.mrf.mxu0 }
 0x107   :  { %v574_v54 = vpop.f32.mrf.mxu3  ;;  %v469_v62 = vpop.f32.mrf.mxu1  ;;  %v442_v2 = vadd.f32 %v1178_v44, %v441_v60 }
 0x108   :  { %v830_v63 = vpack.c.bf16 %v600_v56, %v599_v55  ;;  %v575_v1 = vadd.f32 %v574_v54, %v547_v58 }
 0x109   :  { %v470_v28 = vadd.f32 %v469_v62, %v442_v2 }
 0x10a   :  { %837 = vst [vmem:[%s1247_s6 + $0x8] sm:$0xff] %v830_v63   ;;  %v587_v5 = vmax.f32 %v575_v1, 0.0 }
 0x10b   :  { %v481_v13 = vmax.f32 %v470_v28, 0.0 }
 0x10c   :  { %v548_v3 = vpop.f32.mrf.mxu2  ;;  %v594_v12 = vmax.f32 %v480_v17, %v587_v5 }
 0x10d   :  { %v549_v7 = vadd.f32 %v1178_v44, %v548_v3 }
 0x10e   :  { %v444_v8 = vpop.f32.mrf.mxu0  ;;  %v601_v20 = vmax.f32 %v1199_v39, %v594_v12 }
 0x10f   :  { %v576_v4 = vpop.f32.mrf.mxu3  ;;  %v472_v9 = vpop.f32.mrf.mxu1  ;;  %v445_v11 = vadd.f32 %v1178_v44, %v444_v8 }
 0x110   :  { %v577_v10 = vadd.f32 %v576_v4, %v549_v7 }
 0x111   :  { %v473_v16 = vadd.f32 %v472_v9, %v445_v11 }
 0x112   :  { %v588_v14 = vmax.f32 %v577_v10, 0.0 }
 0x113   :  { %v482_v26 = vmax.f32 %v473_v16, 0.0 }
 0x114   :  { %v595_v15 = vmax.f32 %v481_v13, %v588_v14  ;;  %v551_v18 = vpop.f32.mrf.mxu2 }
 0x115   :  { %v552_v22 = vadd.f32 %v1178_v44, %v551_v18 }
 0x116   :  { %v602_v21 = vmax.f32 %v1203_v51, %v595_v15  ;;  %v446_v23 = vpop.f32.mrf.mxu0 }
 0x117   :  { %v579_v19 = vpop.f32.mrf.mxu3  ;;  %v474_v24 = vpop.f32.mrf.mxu1 }
 0x118   :  { %v835_v25 = vpack.c.bf16 %v602_v21, %v601_v20  ;;  %v580_v27 = vadd.f32 %v579_v19, %v552_v22 }
 0x11a   :  { %838 = vst [vmem:[%s1247_s6 + $0x10] sm:$0xff] %v835_v25   ;;  %v589_v29 = vmax.f32 %v580_v27, 0.0 }
 0x11c   :  { %v596_v30 = vmax.f32 %v482_v26, %v589_v29  ;;  %v553_v31 = vpop.f32.mrf.mxu2 }
 0x11e   :  { %v603_v33 = vmax.f32 %v1206_v61, %v596_v30 }
 0x11f   :  { %v581_v32 = vpop.f32.mrf.mxu3 }
 0x120   :  { %v610_v39 = vpack.c.bf16 %v603_v33, %v603_v33 }
 0x122   :  { %617 = vst [vmem:[%s1247_s6 + $0x18] sm:$0xf] %v610_v39 }

// kernel: lenet_forward.5
= control target key start
LH: loop header
LB: loop body
LE: loop exit
PB: predicated region body
PF: predicated region fallthrough
CT: control target
= control target key end

     0   :  { %s970_s1 = inlined_call_operand.vmem [shape: bf16[512,128], index: 1, kind: input, shape index: {}]   ;;  %s971_s2 = inlined_call_operand.vmem [shape: f32[1,128], index: 2, kind: input, shape index: {}]   ;;  %s972_s0 = inlined_call_operand.vmem [shape: bf16[8,512], index: 0, kind: input, shape index: {}]   ;;  %s973_s3 = inlined_call_operand.vmem [shape: bf16[128,128], index: 3, kind: input, shape index: {}]   ;;  %s974_s4 = inlined_call_operand.vmem [shape: f32[1,128], index: 4, kind: input, shape index: {}]   ;;  %s975_s5 = inlined_call_operand.vmem [shape: bf16[128,128], index: 5, kind: input, shape index: {}]   ;;  %s976_s6 = inlined_call_operand.vmem [shape: f32[1,128], index: 6, kind: input, shape index: {}]   ;;  %s977_s7 = inlined_call_operand.vmem [shape: f32[8,128], index: 7, kind: output, shape index: {}]  }
   0x1   :  { %v724_v0 = vld [vmem:[%s970_s1 + $0x38] sm:$0xff]  ;;  %v723_v4 = vld [vmem:[%s970_s1 + $0x30] sm:$0xff]  ;;  %v722_v8 = vld [vmem:[%s970_s1 + $0x28] sm:$0xff] }
   0x2   :  { %v732_v1 = vld [vmem:[%s970_s1 + $0x78] sm:$0xff]  ;;  %302 = vmatpush.bf16.msra.mxu0 %v724_v0  ;;  %v731_v5 = vld [vmem:[%s970_s1 + $0x70] sm:$0xff]  ;;  %v730_v9 = vld [vmem:[%s970_s1 + $0x68] sm:$0xff] }
   0x3   :  { %v740_v2 = vld [vmem:[%s970_s1 + $0xb8] sm:$0xff]  ;;  %315 = vmatpush.bf16.msra.mxu1 %v732_v1  ;;  %v739_v6 = vld [vmem:[%s970_s1 + $0xb0] sm:$0xff]  ;;  %v738_v10 = vld [vmem:[%s970_s1 + $0xa8] sm:$0xff] }
   0x4   :  { %v748_v3 = vld [vmem:[%s970_s1 + $0xf8] sm:$0xff]  ;;  %328 = vmatpush.bf16.msra.mxu2 %v740_v2  ;;  %v747_v7 = vld [vmem:[%s970_s1 + $0xf0] sm:$0xff]  ;;  %v746_v11 = vld [vmem:[%s970_s1 + $0xe8] sm:$0xff] }
   0x5   :  { %341 = vmatpush.bf16.msra.mxu3 %v748_v3  ;;  %v721_v12 = vld [vmem:[%s970_s1 + $0x20] sm:$0xff]  ;;  %v720_v16 = vld [vmem:[%s970_s1 + $0x18] sm:$0xff]  ;;  %v719_v20 = vld [vmem:[%s970_s1 + $0x10] sm:$0xff] }
   0x6   :  { %303 = vmatpush.bf16.msra.mxu0 %v723_v4  ;;  %v729_v13 = vld [vmem:[%s970_s1 + $0x60] sm:$0xff]  ;;  %v728_v17 = vld [vmem:[%s970_s1 + $0x58] sm:$0xff]  ;;  %v727_v21 = vld [vmem:[%s970_s1 + $0x50] sm:$0xff] }
   0x7   :  { %316 = vmatpush.bf16.msra.mxu1 %v731_v5  ;;  %v737_v14 = vld [vmem:[%s970_s1 + $0xa0] sm:$0xff]  ;;  %v736_v18 = vld [vmem:[%s970_s1 + $0x98] sm:$0xff]  ;;  %v735_v22 = vld [vmem:[%s970_s1 + $0x90] sm:$0xff] }
   0x8   :  { %329 = vmatpush.bf16.msra.mxu2 %v739_v6  ;;  %v745_v15 = vld [vmem:[%s970_s1 + $0xe0] sm:$0xff]  ;;  %v744_v19 = vld [vmem:[%s970_s1 + $0xd8] sm:$0xff]  ;;  %v743_v23 = vld [vmem:[%s970_s1 + $0xd0] sm:$0xff] }
   0x9   :  { %342 = vmatpush.bf16.msra.mxu3 %v747_v7  ;;  %v718_v24 = vld [vmem:[%s970_s1 + $0x8] sm:$0xff]  ;;  %v26_v26 = vld [vmem:[%s972_s0] sm:$0xff]  ;;  %v756_v38 = vld [vmem:[%s973_s3 + $0x38] sm:$0xff] }
   0xa   :  { %304 = vmatpush.bf16.msra.mxu0 %v722_v8  ;;  %v726_v25 = vld [vmem:[%s970_s1 + $0x48] sm:$0xff]  ;;  %v98_v30 = vunpack.c.l.b16 %v26_v26  ;;  %v99_v31 = vunpack.c.h.b16 %v26_v26  ;;  %v717_v32 = vld [vmem:[%s970_s1] sm:$0xff]  ;;  %v755_v43 = vld [vmem:[%s973_s3 + $0x30] sm:$0xff] }
   0xb   :  { %317 = vmatpush.bf16.msra.mxu1 %v730_v9  ;;  %v734_v27 = vld [vmem:[%s970_s1 + $0x88] sm:$0xff]  ;;  %v725_v33 = vld [vmem:[%s970_s1 + $0x40] sm:$0xff]  ;;  %v752_v46 = vld [vmem:[%s973_s3 + $0x18] sm:$0xff] }
   0xc   :  { %330 = vmatpush.bf16.msra.mxu2 %v738_v10  ;;  %v742_v28 = vld [vmem:[%s970_s1 + $0xc8] sm:$0xff]  ;;  %v733_v36 = vld [vmem:[%s970_s1 + $0x80] sm:$0xff]  ;;  %v102_v39 = vpack.c.b16 %v98_v30, %v98_v30  ;;  %v103_v40 = vpack.c.b16 %v99_v31, %v99_v31  ;;  %v751_v47 = vld [vmem:[%s973_s3 + $0x10] sm:$0xff] }
   0xd   :  { %343 = vmatpush.bf16.msra.mxu3 %v746_v11  ;;  %v27_v29 = vld [vmem:[%s972_s0 + $0x8] sm:$0xff]  ;;  %v741_v37 = vld [vmem:[%s970_s1 + $0xc0] sm:$0xff]  ;;  %v764_v50 = vld [vmem:[%s975_s5 + $0x38] sm:$0xff] }
   0xe   :  { %305 = vmatpush.bf16.msra.mxu0 %v721_v12  ;;  %v100_v34 = vunpack.c.l.b16 %v27_v29  ;;  %v101_v35 = vunpack.c.h.b16 %v27_v29  ;;  %v754_v44 = vld [vmem:[%s973_s3 + $0x28] sm:$0xff]  ;;  %v753_v45 = vld [vmem:[%s973_s3 + $0x20] sm:$0xff]  ;;  %v763_v51 = vld [vmem:[%s975_s5 + $0x30] sm:$0xff] }
   0xf   :  { %318 = vmatpush.bf16.msra.mxu1 %v729_v13  ;;  %v750_v48 = vld [vmem:[%s973_s3 + $0x8] sm:$0xff]  ;;  %v749_v49 = vld [vmem:[%s973_s3] sm:$0xff]  ;;  %v760_v55 = vld [vmem:[%s975_s5 + $0x18] sm:$0xff] }
  0x10   :  { %331 = vmatpush.bf16.msra.mxu2 %v737_v14  ;;  %v104_v41 = vpack.c.b16 %v100_v34, %v100_v34  ;;  %v105_v42 = vpack.c.b16 %v101_v35, %v101_v35  ;;  %v762_v52 = vld [vmem:[%s975_s5 + $0x28] sm:$0xff]  ;;  %v761_v53 = vld [vmem:[%s975_s5 + $0x20] sm:$0xff]  ;;  %v759_v59 = vld [vmem:[%s975_s5 + $0x10] sm:$0xff] }
  0x11   :  { %344 = vmatpush.bf16.msra.mxu3 %v745_v15  ;;  %v765_v54 = vld [vmem:[%s971_s2] ss:$0 sm:$0xff]  ;;  %v758_v7 = vld [vmem:[%s975_s5 + $0x8] sm:$0xff] }
  0x12   :  { %306 = vmatpush.bf16.msra.mxu0 %v720_v16  ;;  %v757_v8 = vld [vmem:[%s975_s5] sm:$0xff] }
  0x13   :  { %319 = vmatpush.bf16.msra.mxu1 %v728_v17  ;;  %v766_v9 = vld [vmem:[%s974_s4] ss:$0 sm:$0xff] }
  0x14   :  { %332 = vmatpush.bf16.msra.mxu2 %v736_v18  ;;  %v767_v15 = vld [vmem:[%s976_s6] ss:$0 sm:$0xff] }
  0x15   :  { %345 = vmatpush.bf16.msra.mxu3 %v744_v19 }
  0x16   :  { %307 = vmatpush.bf16.msra.mxu0 %v719_v20 }
  0x17   :  { %320 = vmatpush.bf16.msra.mxu1 %v727_v21 }
  0x18   :  { %333 = vmatpush.bf16.msra.mxu2 %v735_v22 }
  0x19   :  { %346 = vmatpush.bf16.msra.mxu3 %v743_v23 }
  0x1a   :  { %308 = vmatpush.bf16.msra.mxu0 %v718_v24 }
  0x1b   :  { %321 = vmatpush.bf16.msra.mxu1 %v726_v25 }
  0x1c   :  { %334 = vmatpush.bf16.msra.mxu2 %v734_v27 }
  0x1d   :  { %347 = vmatpush.bf16.msra.mxu3 %v742_v28 }
  0x1e   :  { %309 = vmatpush.bf16.msra.mxu0 %v717_v32 }
  0x1f   :  { %322 = vmatpush.bf16.msra.mxu1 %v725_v33 }
  0x20   :  { %335 = vmatpush.bf16.msra.mxu2 %v733_v36 }
  0x21   :  { %348 = vmatpush.bf16.msra.mxu3 %v741_v37  ;;  %310 = vmatmul.bf16.vlgmr.msra.gmra.mxu0 %v102_v39 }
  0x22   :  { %424 = vmatpush.bf16.msrb.mxu0 %v756_v38  ;;  %323 = vmatmul.bf16.vlgmr.msra.gmra.mxu1 %v103_v40 }
  0x23   :  { %336 = vmatmul.bf16.vlgmr.msra.gmra.mxu2 %v104_v41  ;;  %507 = vmatpush.bf16.msrb.mxu1 %v764_v50 }
  0x24   :  { %349 = vmatmul.bf16.vlgmr.msra.gmra.mxu3 %v105_v42 }
  0x26   :  { %425 = vmatpush.bf16.msrb.mxu0 %v755_v43 }
  0x27   :  { %508 = vmatpush.bf16.msrb.mxu1 %v763_v51 }
  0x2a   :  { %426 = vmatpush.bf16.msrb.mxu0 %v754_v44 }
  0x2b   :  { %509 = vmatpush.bf16.msrb.mxu1 %v762_v52 }
  0x2e   :  { %427 = vmatpush.bf16.msrb.mxu0 %v753_v45 }
  0x2f   :  { %510 = vmatpush.bf16.msrb.mxu1 %v761_v53 }
  0x32   :  { %428 = vmatpush.bf16.msrb.mxu0 %v752_v46 }
  0x33   :  { %511 = vmatpush.bf16.msrb.mxu1 %v760_v55 }
  0x36   :  { %429 = vmatpush.bf16.msrb.mxu0 %v751_v47 }
  0x37   :  { %512 = vmatpush.bf16.msrb.mxu1 %v759_v59 }
  0x3a   :  { %430 = vmatpush.bf16.msrb.mxu0 %v750_v48 }
  0x3b   :  { %513 = vmatpush.bf16.msrb.mxu1 %v758_v7 }
  0x3e   :  { %431 = vmatpush.bf16.msrb.mxu0 %v749_v49 }
  0x3f   :  { %514 = vmatpush.bf16.msrb.mxu1 %v757_v8 }
  0x9e   :  { %v311_v56 = vpop.f32.mrf.mxu0 }
  0x9f   :  { %v324_v57 = vpop.f32.mrf.mxu1  ;;  %v312_v58 = vadd.f32 %v765_v54, %v311_v56 }
  0xa1   :  { %v325_v60 = vadd.f32 %v324_v57, %v312_v58 }
  0xa6   :  { %v337_v61 = vpop.f32.mrf.mxu2  ;;  %v313_v0 = vpop.f32.mrf.mxu0 }
  0xa7   :  { %v350_v62 = vpop.f32.mrf.mxu3  ;;  %v338_v63 = vadd.f32 %v337_v61, %v325_v60  ;;  %v326_v1 = vpop.f32.mrf.mxu1 }
  0xa9   :  { %v351_v2 = vadd.f32 %v350_v62, %v338_v63 }
  0xab   :  { %v354_v3 = vmax.f32 %v351_v2, 0.0 }
  0xad   :  { %v355_v4 = vpack.c.bf16 %v354_v3, %v354_v3 }
  0xae   :  { %v339_v5 = vpop.f32.mrf.mxu2 }
  0xaf   :  { %v352_v6 = vpop.f32.mrf.mxu3  ;;  %432 = vmatmul.bf16.vlgmr.msrb.gmra.mxu0 %v355_v4 }
 0x12c   :  { %v433_v10 = vpop.f32.mrf.mxu0 }
 0x12d   :  { %v434_v11 = vadd.f32 %v766_v9, %v433_v10 }
 0x12f   :  { %v437_v12 = vmax.f32 %v434_v11, 0.0 }
 0x131   :  { %v438_v13 = vpack.c.bf16 %v437_v12, %v437_v12 }
 0x133   :  { %515 = vmatmul.bf16.vlgmr.msrb.gmra.mxu1 %v438_v13 }
 0x134   :  { %v435_v14 = vpop.f32.mrf.mxu0 }
 0x1b0   :  { %v516_v16 = vpop.f32.mrf.mxu1 }
 0x1b1   :  { %v517_v17 = vadd.f32 %v767_v15, %v516_v16 }
 0x1b3   :  { %520 = vst [vmem:[%s977_s7] sm:$0xff] %v517_v17 }
 0x1b8   :  { %v518_v18 = vpop.f32.mrf.mxu1 }

</bundles_post_ra>
